<compile_context>
chip_gen: v7x
topology: tpu7x:2x2x1
jax: 0.10.0
libtpu: 0.0.40
codegen_flags: <defaults>
</compile_context>

<pallas_src>
import numpy as np
import jax
import jax.numpy as jnp
from jax.experimental import pallas as pl
from jax.experimental.pallas import tpu as pltpu


# ------------------------------------------------------------------
# Fused Pallas kernel (single program, no grid)
# ------------------------------------------------------------------
def _make_kernel(nf, CW, L):
    """nf = num focuses, CW = C*W (useful lanes per focus), L = padded lane width."""
    f32 = jnp.float32

    def kernel(t2_ref, ur_ref, ui_ref,
               fx12r_ref, fx12i_ref, gy12r_ref, gy12i_ref,
               fx3r_ref, fx3i_ref, gy3r_ref, gy3i_ref,
               m_ref, xq_ref, yq_ref, out_ref):
        # Shapes:
        #   t2      : (nf,)   SMEM   per-focus eye-lens phase scale
        #   ur/ui   : (H, L)  VMEM   SLM field, lane-padded wide layout (zeros beyond CW)
        #   fx12*   : (H, H)         composed relay+eyepiece row-DFT (term1 folded)
        #   gy12*   : (L, L)         block-diag composed column-DFT over C (term1 folded)
        #   fx3*    : (H, H)         eye->retina row-DFT (term3 folded)
        #   gy3*    : (L, L)         block-diag eye->retina column-DFT over nf*C (term3 folded)
        #   m       : (H, L)         aperture mask (tiled over C, zeros in padding)
        #   xq      : (H, 1)         x_eye^2
        #   yq      : (1, L)         y_eye^2 (tiled over C, zeros in padding)
        #   out     : (H, 2*L)       [ abs | angle ] lane-stacked
        ur = ur_ref[...]
        ui = ui_ref[...]

        # ---- stage 1+2: composed relay + eyepiece OFT:  V = Fx12 @ U @ BD(Fy12T)
        fxr = fx12r_ref[...]
        fxi = fx12i_ref[...]
        ar = (jnp.dot(fxr, ur, preferred_element_type=f32)
              - jnp.dot(fxi, ui, preferred_element_type=f32))
        ai = (jnp.dot(fxr, ui, preferred_element_type=f32)
              + jnp.dot(fxi, ur, preferred_element_type=f32))
        gyr = gy12r_ref[...]
        gyi = gy12i_ref[...]
        vr = (jnp.dot(ar, gyr, preferred_element_type=f32)
              - jnp.dot(ai, gyi, preferred_element_type=f32))
        vi = (jnp.dot(ar, gyi, preferred_element_type=f32)
              + jnp.dot(ai, gyr, preferred_element_type=f32))

        # ---- circular aperture mask: focus independent, applied once
        m = m_ref[...]
        vmr = vr * m
        vmi = vi * m

        xq = xq_ref[...]          # (H, 1)
        yq = yq_ref[...]          # (1, L)

        # ---- per-focus separable eye-lens phase; pack focuses along lanes
        wbr = None
        wbi = None
        for f in range(nf):                        # static unroll over focuses
            t2 = t2_ref[f]
            pxc = jnp.cos(t2 * xq)                 # (H, 1)   — O(H) transcendentals
            pxs = jnp.sin(t2 * xq)
            pyc = jnp.cos(t2 * yq)                 # (1, L)   — O(W) transcendentals
            pys = jnp.sin(t2 * yq)
            pr = pxc * pyc - pxs * pys             # (H, L) via broadcast
            pim = pxc * pys + pxs * pyc
            wr = vmr * pr - vmi * pim
            wi = vmr * pim + vmi * pr
            if f == 0:
                wbr, wbi = wr, wi
            else:
                # data lives in lanes [0, CW); padding lanes are exactly zero,
                # so a lane-roll places focus f at lanes [f*CW, (f+1)*CW).
                wbr = wbr + pltpu.roll(wr, shift=f * CW, axis=1)
                wbi = wbi + pltpu.roll(wi, shift=f * CW, axis=1)

        # ---- stage 3 (batched over all focuses): Out = Fx3 @ Wbig @ BD(Fy3T)
        fx3r = fx3r_ref[...]
        fx3i = fx3i_ref[...]
        br = (jnp.dot(fx3r, wbr, preferred_element_type=f32)
              - jnp.dot(fx3i, wbi, preferred_element_type=f32))
        bi = (jnp.dot(fx3r, wbi, preferred_element_type=f32)
              + jnp.dot(fx3i, wbr, preferred_element_type=f32))
        gy3r = gy3r_ref[...]
        gy3i = gy3i_ref[...]
        outr = (jnp.dot(br, gy3r, preferred_element_type=f32)
                - jnp.dot(bi, gy3i, preferred_element_type=f32))
        outi = (jnp.dot(br, gy3i, preferred_element_type=f32)
                + jnp.dot(bi, gy3r, preferred_element_type=f32))

        # ---- abs / angle over the full-width slab, one dense lane-stacked store
        out_ref[:, 0:L] = jnp.sqrt(outr * outr + outi * outi)
        out_ref[:, L:2 * L] = jnp.arctan2(outi, outr)

    return kernel


def _fused_call(t2, ur_w, ui_w, consts, *, nf, CW, L, H):
    kernel = _make_kernel(nf, CW, L)
    vmem = pl.BlockSpec(memory_space=pltpu.MemorySpace.VMEM)
    smem = pl.BlockSpec(memory_space=pltpu.MemorySpace.SMEM)
    return pl.pallas_call(
        kernel,
        out_shape=jax.ShapeDtypeStruct((H, 2 * L), jnp.float32),
        in_specs=[smem] + [vmem] * 13,
        out_specs=vmem,
    )(t2, ur_w, ui_w,
      consts["fx12r"], consts["fx12i"], consts["gy12r"], consts["gy12i"],
      consts["fx3r"], consts["fx3i"], consts["gy3r"], consts["gy3i"],
      consts["m_w"], consts["xq"], consts["yq_w"])


# ------------------------------------------------------------------
# Single-jit forward path (layout shuffles fused around the custom call)
# ------------------------------------------------------------------
@jax.jit
def _forward_jit(u_slm, eye_focal_lengths, wavelength, eye_retina_distance, consts):
    B, _, _, C, H, W = u_slm.shape
    nf = eye_focal_lengths.shape[0]
    CW = C * W
    L = consts["gy3r"].shape[0]

    # per-focus eye-lens phase scale (term2):  -pi * Pvirtual / wavelength
    p_virt = 1.0 / eye_focal_lengths - 1.0 / eye_retina_distance
    t2 = (-jnp.pi / wavelength * p_virt).astype(jnp.float32)

    u = u_slm.reshape(C, H, W)
    ur = jnp.real(u).astype(jnp.float32)
    ui = jnp.imag(u).astype(jnp.float32)
    # wide layout: channel stack along lanes -> (H, C*W), zero-pad to L lanes
    ur_w = jnp.transpose(ur, (1, 0, 2)).reshape(H, CW)
    ui_w = jnp.transpose(ui, (1, 0, 2)).reshape(H, CW)
    pad = L - CW
    if pad:
        z = jnp.zeros((H, pad), jnp.float32)
        ur_w = jnp.concatenate([ur_w, z], axis=1)
        ui_w = jnp.concatenate([ui_w, z], axis=1)

    out = _fused_call(t2, ur_w, ui_w, consts, nf=nf, CW=CW, L=L, H=H)

    mag = out[:, :nf * CW]
    ang = out[:, L:L + nf * CW]

    def _unpack(x):
        return (x.reshape(H, nf, C, W)
                 .transpose(1, 2, 0, 3)
                 .reshape(1, nf, 1, C, H, W))

    return _unpack(mag), _unpack(ang)


# ------------------------------------------------------------------
# Host-side precompute (synthetic LensOFT: standard matrix-form lens optical
# Fourier transform with wavelength-scaled output coordinates — the original
# LensOFT source is not provided).
# ------------------------------------------------------------------
def _lens_oft_matrices(f, dx_in, dy_in, cx_in, cy_in, Nx, Ny, wavelength):
    x_in = cx_in + dx_in * np.arange(Nx)
    y_in = cy_in + dy_in * np.arange(Ny)
    dx_out = wavelength * f / (Nx * dx_in)
    dy_out = wavelength * f / (Ny * dy_in)
    cx_out = -(Nx // 2) * dx_out
    cy_out = -(Ny // 2) * dy_out
    x_out = cx_out + dx_out * np.arange(Nx)
    y_out = cy_out + dy_out * np.arange(Ny)
    pre = dx_in * dy_in / (1j * wavelength * f)
    Fx = pre * np.exp(-1j * 2.0 * np.pi * np.outer(x_out, x_in) / (wavelength * f))
    FyT = np.exp(-1j * 2.0 * np.pi * np.outer(y_in, y_out) / (wavelength * f))
    return Fx, FyT, x_out, y_out, dx_out, dy_out, cx_out, cy_out


def _block_diag_pad(mat, reps, L):
    """Block-diagonal with `reps` copies of `mat`, zero-padded to (L, L)."""
    n, m = mat.shape
    out = np.zeros((L, L), dtype=mat.dtype)
    for k in range(reps):
        out[k * n:(k + 1) * n, k * m:(k + 1) * m] = mat
    return out


def _split(c_mat):
    return (jnp.asarray(np.real(c_mat), jnp.float32),
            jnp.asarray(np.imag(c_mat), jnp.float32))


# ------------------------------------------------------------------
# Propagator
# ------------------------------------------------------------------
class FarFieldHolographicPropagatorPallas:
    def __init__(self, Nx_slm=16, Ny_slm=16, dx_slm=8e-6, dy_slm=8e-6,
                 wavelength=520e-9, focal_length=0.05,
                 eyepiece_focal_length=0.04, eye_retina_distance=0.024,
                 dz_max=0.01, eye_diameter=0.004):
        self.Nx_slm, self.Ny_slm = Nx_slm, Ny_slm
        self.wavelength = float(wavelength)
        self.eye_retina_distance = float(eye_retina_distance)

        cx_slm = -(Nx_slm // 2) * dx_slm
        cy_slm = -(Ny_slm // 2) * dy_slm

        # lens1 (relay) OFT
        Fx1, Fy1T, _, _, dx1, dy1, cx1, cy1 = _lens_oft_matrices(
            focal_length, dx_slm, dy_slm, cx_slm, cy_slm, Nx_slm, Ny_slm, wavelength)
        # eyepiece OFT -> eye pupil plane coordinates
        Fx2, Fy2T, x_eye, y_eye, dx2, dy2, cx2, cy2 = _lens_oft_matrices(
            eyepiece_focal_length, dx1, dy1, cx1, cy1, Nx_slm, Ny_slm, wavelength)
        # eye -> retina OFT -> focal-stack (retina) coordinates
        Fx3, Fy3T, x_fs, y_fs, _, _, _, _ = _lens_oft_matrices(
            eye_retina_distance, dx2, dy2, cx2, cy2, Nx_slm, Ny_slm, wavelength)

        # ---- compose relay + eyepiece OFTs (no elementwise op in between)
        Fx12 = Fx2 @ Fx1
        Fy12T = Fy1T @ Fy2T

        # ---- fold static separable eyepiece quadratic phase (term1) into Fx12/Fy12T
        d = eyepiece_focal_length - dz_max / 2.0
        t1 = 2.0 * np.pi / (wavelength * 2.0 * eyepiece_focal_length) * (1.0 - d / eyepiece_focal_length)
        Fx12 = np.exp(1j * t1 * x_eye ** 2)[:, None] * Fx12
        Fy12T = Fy12T * np.exp(1j * t1 * y_eye ** 2)[None, :]

        # ---- fold separable retina quadratic phase (term3) into Fx3/Fy3T
        t3 = 2.0 * np.pi / (wavelength * 2.0 * eye_retina_distance)
        Fx3 = np.exp(1j * t3 * x_fs ** 2)[:, None] * Fx3
        Fy3T = Fy3T * np.exp(1j * t3 * y_fs ** 2)[None, :]

        self._Fx12, self._Fy12T = Fx12, Fy12T
        self._Fx3, self._Fy3T = Fx3, Fy3T
        self._x_eye, self._y_eye = x_eye, y_eye

        # Aperture mask: matches the torch reference literally, which compares
        # X^2+Y^2 (m^2) against eye_diameter/2 (m).  Kept as-is per the spec.
        X_eye, Y_eye = np.meshgrid(x_eye, y_eye, indexing="ij")
        q_eye = X_eye ** 2 + Y_eye ** 2
        self._mask = (q_eye <= eye_diameter / 2.0).astype(np.float32)

        self._consts_cache = {}   # keyed by (C, num_focuses)

    def _get_consts(self, C, nf):
        key = (C, nf)
        if key in self._consts_cache:
            return self._consts_cache[key]
        H, W = self.Nx_slm, self.Ny_slm
        CW = C * W
        L = ((nf * CW + 127) // 128) * 128      # lane-dense padded width

        fx12r, fx12i = _split(self._Fx12)
        fx3r, fx3i = _split(self._Fx3)
        gy12r, gy12i = _split(_block_diag_pad(self._Fy12T, C, L))
        gy3r, gy3i = _split(_block_diag_pad(self._Fy3T, nf * C, L))

        m = np.zeros((H, L), np.float32)
        m[:, :CW] = np.tile(self._mask, (1, C))
        xq = jnp.asarray((self._x_eye ** 2).reshape(H, 1), jnp.float32)
        yq = np.zeros((1, L), np.float32)
        yq[0, :CW] = np.tile(self._y_eye ** 2, C)

        consts = dict(fx12r=fx12r, fx12i=fx12i, gy12r=gy12r, gy12i=gy12i,
                      fx3r=fx3r, fx3i=fx3i, gy3r=gy3r, gy3i=gy3i,
                      m_w=jnp.asarray(m), xq=xq, yq_w=jnp.asarray(yq))
        self._consts_cache[key] = consts
        return consts

    def forward(self, u_slm, eye_focal_lengths):
        """u_slm: complex64 (B, 1, 1, C, H, W) with B == 1.  Returns
        (focal_stack_abs, focal_stack_phase), each float32 (1, F, 1, C, H, W)."""
        B, _, _, C, H, W = u_slm.shape
        assert B == 1 and H == self.Nx_slm and W == self.Ny_slm
        # TODO(synk): B > 1 would fold into the channel stack / a grid axis;
        # the torch reference's postprocess also only supports B == 1.
        nf = int(eye_focal_lengths.shape[0])
        consts = self._get_consts(C, nf)
        eye_f = jnp.asarray(eye_focal_lengths, jnp.float32)
        # TODO(synk): torch interpolate(..., size=[Nx_slm, Ny_slm], bilinear,
        # antialias, align_corners=True) is the identity here because the synthetic
        # LensOFT keeps H3 == Nx_slm and W3 == Ny_slm; a general antialiased
        # bilinear resize is not implemented.
        return _forward_jit(u_slm, eye_f, self.wavelength,
                            self.eye_retina_distance, consts)


# ------------------------------------------------------------------
if __name__ == "__main__":
    key = jax.random.PRNGKey(0)
    B, C, H, W = 1, 3, 16, 16
    k1, k2 = jax.random.split(key, 2)
    amp = jax.random.uniform(k1, (B, 1, 1, C, H, W), jnp.float32)
    phs = jax.random.uniform(k2, (B, 1, 1, C, H, W), jnp.float32,
                             -float(np.pi), float(np.pi))
    u_slm = (amp * jnp.exp(1j * phs)).astype(jnp.complex64)
    eye_focal_lengths = jnp.array([0.040, 0.050], dtype=jnp.float32)  # num_focuses = 2

    prop = FarFieldHolographicPropagatorPallas(Nx_slm=H, Ny_slm=W)
    focal_abs, focal_phase = prop.forward(u_slm, eye_focal_lengths)
    focal_abs = jax.block_until_ready(focal_abs)
    focal_phase = jax.block_until_ready(focal_phase)

    assert focal_abs.shape == (1, 2, 1, C, H, W)
    assert focal_phase.shape == (1, 2, 1, C, H, W)
    assert bool(jnp.all(jnp.isfinite(focal_abs)))
    assert bool(jnp.all(jnp.isfinite(focal_phase)))
    print("KERNEL_OK")
</pallas_src>

<mosaic_0001>
module attributes {stable_mosaic.version = 11 : i64} {
  func.func @kernel(%arg0: memref<2xf32, #tpu.memory_space<smem>>, %arg1: memref<16x128xf32, #tpu.memory_space<vmem>>, %arg2: memref<16x128xf32, #tpu.memory_space<vmem>>, %arg3: memref<16x16xf32, #tpu.memory_space<vmem>>, %arg4: memref<16x16xf32, #tpu.memory_space<vmem>>, %arg5: memref<128x128xf32, #tpu.memory_space<vmem>>, %arg6: memref<128x128xf32, #tpu.memory_space<vmem>>, %arg7: memref<16x16xf32, #tpu.memory_space<vmem>>, %arg8: memref<16x16xf32, #tpu.memory_space<vmem>>, %arg9: memref<128x128xf32, #tpu.memory_space<vmem>>, %arg10: memref<128x128xf32, #tpu.memory_space<vmem>>, %arg11: memref<16x128xf32, #tpu.memory_space<vmem>>, %arg12: memref<16x1xf32, #tpu.memory_space<vmem>>, %arg13: memref<1x128xf32, #tpu.memory_space<vmem>>, %arg14: memref<16x256xf32, #tpu.memory_space<vmem>>) attributes {dimension_semantics = [], scalar_prefetch = 0 : i64, scratch_operands = 0 : i64, tpu.core_type = #tpu.core_type<tc>} {
    %c0 = arith.constant 0 : index
    %c0_0 = arith.constant 0 : index
    %0 = vector.load %arg1[%c0, %c0_0] : memref<16x128xf32, #tpu.memory_space<vmem>>, vector<16x128xf32>
    %c0_1 = arith.constant 0 : index
    %c0_2 = arith.constant 0 : index
    %1 = vector.load %arg2[%c0_1, %c0_2] : memref<16x128xf32, #tpu.memory_space<vmem>>, vector<16x128xf32>
    %c0_3 = arith.constant 0 : index
    %c0_4 = arith.constant 0 : index
    %2 = vector.load %arg3[%c0_3, %c0_4] : memref<16x16xf32, #tpu.memory_space<vmem>>, vector<16x16xf32>
    %c0_5 = arith.constant 0 : index
    %c0_6 = arith.constant 0 : index
    %3 = vector.load %arg4[%c0_5, %c0_6] : memref<16x16xf32, #tpu.memory_space<vmem>>, vector<16x16xf32>
    %cst = arith.constant dense<0.000000e+00> : vector<16x128xf32>
    %4 = tpu.matmul %2, %0, %cst {dimension_numbers = #tpu.dot_dimension_numbers<[1], [0], [0], [1], [0, 0, 1, 1], [], []>} : vector<16x16xf32>, vector<16x128xf32>, vector<16x128xf32> -> vector<16x128xf32>
    %cst_7 = arith.constant dense<0.000000e+00> : vector<16x128xf32>
    %5 = tpu.matmul %3, %1, %cst_7 {dimension_numbers = #tpu.dot_dimension_numbers<[1], [0], [0], [1], [0, 0, 1, 1], [], []>} : vector<16x16xf32>, vector<16x128xf32>, vector<16x128xf32> -> vector<16x128xf32>
    %6 = arith.subf %4, %5 : vector<16x128xf32>
    %cst_8 = arith.constant dense<0.000000e+00> : vector<16x128xf32>
    %7 = tpu.matmul %2, %1, %cst_8 {dimension_numbers = #tpu.dot_dimension_numbers<[1], [0], [0], [1], [0, 0, 1, 1], [], []>} : vector<16x16xf32>, vector<16x128xf32>, vector<16x128xf32> -> vector<16x128xf32>
    %cst_9 = arith.constant dense<0.000000e+00> : vector<16x128xf32>
    %8 = tpu.matmul %3, %0, %cst_9 {dimension_numbers = #tpu.dot_dimension_numbers<[1], [0], [0], [1], [0, 0, 1, 1], [], []>} : vector<16x16xf32>, vector<16x128xf32>, vector<16x128xf32> -> vector<16x128xf32>
    %9 = arith.addf %7, %8 : vector<16x128xf32>
    %c0_10 = arith.constant 0 : index
    %c0_11 = arith.constant 0 : index
    %10 = vector.load %arg5[%c0_10, %c0_11] : memref<128x128xf32, #tpu.memory_space<vmem>>, vector<128x128xf32>
    %c0_12 = arith.constant 0 : index
    %c0_13 = arith.constant 0 : index
    %11 = vector.load %arg6[%c0_12, %c0_13] : memref<128x128xf32, #tpu.memory_space<vmem>>, vector<128x128xf32>
    %cst_14 = arith.constant dense<0.000000e+00> : vector<16x128xf32>
    %12 = tpu.matmul %6, %10, %cst_14 {dimension_numbers = #tpu.dot_dimension_numbers<[1], [0], [0], [1], [0, 0, 1, 1], [], []>} : vector<16x128xf32>, vector<128x128xf32>, vector<16x128xf32> -> vector<16x128xf32>
    %cst_15 = arith.constant dense<0.000000e+00> : vector<16x128xf32>
    %13 = tpu.matmul %9, %11, %cst_15 {dimension_numbers = #tpu.dot_dimension_numbers<[1], [0], [0], [1], [0, 0, 1, 1], [], []>} : vector<16x128xf32>, vector<128x128xf32>, vector<16x128xf32> -> vector<16x128xf32>
    %14 = arith.subf %12, %13 : vector<16x128xf32>
    %cst_16 = arith.constant dense<0.000000e+00> : vector<16x128xf32>
    %15 = tpu.matmul %6, %11, %cst_16 {dimension_numbers = #tpu.dot_dimension_numbers<[1], [0], [0], [1], [0, 0, 1, 1], [], []>} : vector<16x128xf32>, vector<128x128xf32>, vector<16x128xf32> -> vector<16x128xf32>
    %cst_17 = arith.constant dense<0.000000e+00> : vector<16x128xf32>
    %16 = tpu.matmul %9, %10, %cst_17 {dimension_numbers = #tpu.dot_dimension_numbers<[1], [0], [0], [1], [0, 0, 1, 1], [], []>} : vector<16x128xf32>, vector<128x128xf32>, vector<16x128xf32> -> vector<16x128xf32>
    %17 = arith.addf %15, %16 : vector<16x128xf32>
    %c0_18 = arith.constant 0 : index
    %c0_19 = arith.constant 0 : index
    %18 = vector.load %arg11[%c0_18, %c0_19] : memref<16x128xf32, #tpu.memory_space<vmem>>, vector<16x128xf32>
    %19 = arith.mulf %14, %18 : vector<16x128xf32>
    %20 = arith.mulf %17, %18 : vector<16x128xf32>
    %c0_20 = arith.constant 0 : index
    %c0_21 = arith.constant 0 : index
    %21 = vector.load %arg12[%c0_20, %c0_21] : memref<16x1xf32, #tpu.memory_space<vmem>>, vector<16x1xf32>
    %c0_22 = arith.constant 0 : index
    %c0_23 = arith.constant 0 : index
    %22 = vector.load %arg13[%c0_22, %c0_23] : memref<1x128xf32, #tpu.memory_space<vmem>>, vector<1x128xf32>
    %c0_24 = arith.constant 0 : index
    %23 = memref.load %arg0[%c0_24] : memref<2xf32, #tpu.memory_space<smem>>
    %24 = vector.broadcast %23 : f32 to vector<16x1xf32>
    %25 = arith.mulf %24, %21 : vector<16x1xf32>
    %26 = math.cos %25 : vector<16x1xf32>
    %27 = vector.broadcast %23 : f32 to vector<16x1xf32>
    %28 = arith.mulf %27, %21 : vector<16x1xf32>
    %29 = math.sin %28 : vector<16x1xf32>
    %30 = vector.broadcast %23 : f32 to vector<1x128xf32>
    %31 = arith.mulf %30, %22 : vector<1x128xf32>
    %32 = math.cos %31 : vector<1x128xf32>
    %33 = vector.broadcast %23 : f32 to vector<1x128xf32>
    %34 = arith.mulf %33, %22 : vector<1x128xf32>
    %35 = math.sin %34 : vector<1x128xf32>
    %36 = vector.broadcast %26 : vector<16x1xf32> to vector<16x128xf32>
    %37 = vector.broadcast %32 : vector<1x128xf32> to vector<16x128xf32>
    %38 = arith.mulf %36, %37 : vector<16x128xf32>
    %39 = vector.broadcast %29 : vector<16x1xf32> to vector<16x128xf32>
    %40 = vector.broadcast %35 : vector<1x128xf32> to vector<16x128xf32>
    %41 = arith.mulf %39, %40 : vector<16x128xf32>
    %42 = arith.subf %38, %41 : vector<16x128xf32>
    %43 = vector.broadcast %26 : vector<16x1xf32> to vector<16x128xf32>
    %44 = vector.broadcast %35 : vector<1x128xf32> to vector<16x128xf32>
    %45 = arith.mulf %43, %44 : vector<16x128xf32>
    %46 = vector.broadcast %29 : vector<16x1xf32> to vector<16x128xf32>
    %47 = vector.broadcast %32 : vector<1x128xf32> to vector<16x128xf32>
    %48 = arith.mulf %46, %47 : vector<16x128xf32>
    %49 = arith.addf %45, %48 : vector<16x128xf32>
    %50 = arith.mulf %19, %42 : vector<16x128xf32>
    %51 = arith.mulf %20, %49 : vector<16x128xf32>
    %52 = arith.subf %50, %51 : vector<16x128xf32>
    %53 = arith.mulf %19, %49 : vector<16x128xf32>
    %54 = arith.mulf %20, %42 : vector<16x128xf32>
    %55 = arith.addf %53, %54 : vector<16x128xf32>
    %c1 = arith.constant 1 : index
    %56 = memref.load %arg0[%c1] : memref<2xf32, #tpu.memory_space<smem>>
    %57 = vector.broadcast %56 : f32 to vector<16x1xf32>
    %58 = arith.mulf %57, %21 : vector<16x1xf32>
    %59 = math.cos %58 : vector<16x1xf32>
    %60 = vector.broadcast %56 : f32 to vector<16x1xf32>
    %61 = arith.mulf %60, %21 : vector<16x1xf32>
    %62 = math.sin %61 : vector<16x1xf32>
    %63 = vector.broadcast %56 : f32 to vector<1x128xf32>
    %64 = arith.mulf %63, %22 : vector<1x128xf32>
    %65 = math.cos %64 : vector<1x128xf32>
    %66 = vector.broadcast %56 : f32 to vector<1x128xf32>
    %67 = arith.mulf %66, %22 : vector<1x128xf32>
    %68 = math.sin %67 : vector<1x128xf32>
    %69 = vector.broadcast %59 : vector<16x1xf32> to vector<16x128xf32>
    %70 = vector.broadcast %65 : vector<1x128xf32> to vector<16x128xf32>
    %71 = arith.mulf %69, %70 : vector<16x128xf32>
    %72 = vector.broadcast %62 : vector<16x1xf32> to vector<16x128xf32>
    %73 = vector.broadcast %68 : vector<1x128xf32> to vector<16x128xf32>
    %74 = arith.mulf %72, %73 : vector<16x128xf32>
    %75 = arith.subf %71, %74 : vector<16x128xf32>
    %76 = vector.broadcast %59 : vector<16x1xf32> to vector<16x128xf32>
    %77 = vector.broadcast %68 : vector<1x128xf32> to vector<16x128xf32>
    %78 = arith.mulf %76, %77 : vector<16x128xf32>
    %79 = vector.broadcast %62 : vector<16x1xf32> to vector<16x128xf32>
    %80 = vector.broadcast %65 : vector<1x128xf32> to vector<16x128xf32>
    %81 = arith.mulf %79, %80 : vector<16x128xf32>
    %82 = arith.addf %78, %81 : vector<16x128xf32>
    %83 = arith.mulf %19, %75 : vector<16x128xf32>
    %84 = arith.mulf %20, %82 : vector<16x128xf32>
    %85 = arith.subf %83, %84 : vector<16x128xf32>
    %86 = arith.mulf %19, %82 : vector<16x128xf32>
    %87 = arith.mulf %20, %75 : vector<16x128xf32>
    %88 = arith.addf %86, %87 : vector<16x128xf32>
    %c48_i32 = arith.constant 48 : i32
    %89 = tpu.dynamic_rotate %85 by %c48_i32 dim 1 : vector<16x128xf32>, i32 -> vector<16x128xf32>
    %90 = arith.addf %52, %89 : vector<16x128xf32>
    %c48_i32_25 = arith.constant 48 : i32
    %91 = tpu.dynamic_rotate %88 by %c48_i32_25 dim 1 : vector<16x128xf32>, i32 -> vector<16x128xf32>
    %92 = arith.addf %55, %91 : vector<16x128xf32>
    %c0_26 = arith.constant 0 : index
    %c0_27 = arith.constant 0 : index
    %93 = vector.load %arg7[%c0_26, %c0_27] : memref<16x16xf32, #tpu.memory_space<vmem>>, vector<16x16xf32>
    %c0_28 = arith.constant 0 : index
    %c0_29 = arith.constant 0 : index
    %94 = vector.load %arg8[%c0_28, %c0_29] : memref<16x16xf32, #tpu.memory_space<vmem>>, vector<16x16xf32>
    %cst_30 = arith.constant dense<0.000000e+00> : vector<16x128xf32>
    %95 = tpu.matmul %93, %90, %cst_30 {dimension_numbers = #tpu.dot_dimension_numbers<[1], [0], [0], [1], [0, 0, 1, 1], [], []>} : vector<16x16xf32>, vector<16x128xf32>, vector<16x128xf32> -> vector<16x128xf32>
    %cst_31 = arith.constant dense<0.000000e+00> : vector<16x128xf32>
    %96 = tpu.matmul %94, %92, %cst_31 {dimension_numbers = #tpu.dot_dimension_numbers<[1], [0], [0], [1], [0, 0, 1, 1], [], []>} : vector<16x16xf32>, vector<16x128xf32>, vector<16x128xf32> -> vector<16x128xf32>
    %97 = arith.subf %95, %96 : vector<16x128xf32>
    %cst_32 = arith.constant dense<0.000000e+00> : vector<16x128xf32>
    %98 = tpu.matmul %93, %92, %cst_32 {dimension_numbers = #tpu.dot_dimension_numbers<[1], [0], [0], [1], [0, 0, 1, 1], [], []>} : vector<16x16xf32>, vector<16x128xf32>, vector<16x128xf32> -> vector<16x128xf32>
    %cst_33 = arith.constant dense<0.000000e+00> : vector<16x128xf32>
    %99 = tpu.matmul %94, %90, %cst_33 {dimension_numbers = #tpu.dot_dimension_numbers<[1], [0], [0], [1], [0, 0, 1, 1], [], []>} : vector<16x16xf32>, vector<16x128xf32>, vector<16x128xf32> -> vector<16x128xf32>
    %100 = arith.addf %98, %99 : vector<16x128xf32>
    %c0_34 = arith.constant 0 : index
    %c0_35 = arith.constant 0 : index
    %101 = vector.load %arg9[%c0_34, %c0_35] : memref<128x128xf32, #tpu.memory_space<vmem>>, vector<128x128xf32>
    %c0_36 = arith.constant 0 : index
    %c0_37 = arith.constant 0 : index
    %102 = vector.load %arg10[%c0_36, %c0_37] : memref<128x128xf32, #tpu.memory_space<vmem>>, vector<128x128xf32>
    %cst_38 = arith.constant dense<0.000000e+00> : vector<16x128xf32>
    %103 = tpu.matmul %97, %101, %cst_38 {dimension_numbers = #tpu.dot_dimension_numbers<[1], [0], [0], [1], [0, 0, 1, 1], [], []>} : vector<16x128xf32>, vector<128x128xf32>, vector<16x128xf32> -> vector<16x128xf32>
    %cst_39 = arith.constant dense<0.000000e+00> : vector<16x128xf32>
    %104 = tpu.matmul %100, %102, %cst_39 {dimension_numbers = #tpu.dot_dimension_numbers<[1], [0], [0], [1], [0, 0, 1, 1], [], []>} : vector<16x128xf32>, vector<128x128xf32>, vector<16x128xf32> -> vector<16x128xf32>
    %105 = arith.subf %103, %104 : vector<16x128xf32>
    %cst_40 = arith.constant dense<0.000000e+00> : vector<16x128xf32>
    %106 = tpu.matmul %97, %102, %cst_40 {dimension_numbers = #tpu.dot_dimension_numbers<[1], [0], [0], [1], [0, 0, 1, 1], [], []>} : vector<16x128xf32>, vector<128x128xf32>, vector<16x128xf32> -> vector<16x128xf32>
    %cst_41 = arith.constant dense<0.000000e+00> : vector<16x128xf32>
    %107 = tpu.matmul %100, %101, %cst_41 {dimension_numbers = #tpu.dot_dimension_numbers<[1], [0], [0], [1], [0, 0, 1, 1], [], []>} : vector<16x128xf32>, vector<128x128xf32>, vector<16x128xf32> -> vector<16x128xf32>
    %108 = arith.addf %106, %107 : vector<16x128xf32>
    %109 = arith.mulf %105, %105 : vector<16x128xf32>
    %110 = arith.mulf %108, %108 : vector<16x128xf32>
    %111 = arith.addf %109, %110 : vector<16x128xf32>
    %112 = math.sqrt %111 : vector<16x128xf32>
    %c0_42 = arith.constant 0 : index
    %c0_43 = arith.constant 0 : index
    %113 = vector.load %arg14[%c0_42, %c0_43] : memref<16x256xf32, #tpu.memory_space<vmem>>, vector<16x128xf32>
    tpu.vector_store %arg14[%c0_42, %c0_43], %112 {strides = array<i32>} : memref<16x256xf32, #tpu.memory_space<vmem>>, vector<16x128xf32>,
    %114 = math.atan2 %108, %105 : vector<16x128xf32>
    %c0_44 = arith.constant 0 : index
    %c128 = arith.constant 128 : index
    %115 = vector.load %arg14[%c0_44, %c128] : memref<16x256xf32, #tpu.memory_space<vmem>>, vector<16x128xf32>
    tpu.vector_store %arg14[%c0_44, %c128], %114 {strides = array<i32>} : memref<16x256xf32, #tpu.memory_space<vmem>>, vector<16x128xf32>,
    return
  }
}

</mosaic_0001>

<bundles_post_ra>
// kernel: custom-call.1
= control target key start
LH: loop header
LB: loop body
LE: loop exit
PB: predicated region body
PF: predicated region fallthrough
CT: control target
= control target key end

     0   :  { %s59_s0 = inlined_call_operand.hbm [shape: c64[1,1,1,3,16,16], index: 0, kind: input, shape index: {}]   ;;  %s60_s1 = inlined_call_operand.vmem [shape: f32[1,1,1,3,16,16], index: 1, kind: output, shape index: {}]  }
   0x1   :  { %s2_s8 = scalar_lea.hbm %s59_s0, 768 }
   0x2   :  { %3 = vsyncpa [#allocation0], 0  ;;  %s4_s11 = sshll.u32 %s60_s1, 4  ;;  %s34_s14 = scalar_lea.hbm %s59_s0, 1536  ;;  %s5_s11 = int_to_ptr.vmem [resolvable:$true] %s4_s11 }
   0x3   :  { %p11_p0 = scmp.ne.s32.totalorder %s2_s8, %s34_s14  ;;  %p13_p1 = scmp.lt.u32.totalorder %s2_s8, %s59_s0 }
   0x4   :  { %p14_p2 = scmp.lt.u32.totalorder %s34_s14, %s34_s14  ;;  %p16_p4 = scmp.lt.u32.totalorder %s34_s14, %s2_s8 }
   0x6   :  { %p15_p3 = por %p14_p2, %p13_p1 }
   0x8   :  { %p17_p5 = por %p16_p4, %p15_p3 }
   0xa   :  { %p18_p6 = pnand %p17_p5, %p11_p0 }
   0xc   :  { %21 = shalt.err (!%p18_p6)  }
   0xd   :  { %s22_s17 = scalar_lea.vmem %s5_s11, 768  ;;  %p27_p8 = scmp.lt.s32.totalorder %s5_s11, %s5_s11 }
   0xe   :  { %p23_p7 = scmp.ne.s32.totalorder %s5_s11, %s22_s17  ;;  %p28_p9 = scmp.lt.s32.totalorder %s22_s17, %s22_s17 }
  0x10   :  { %p29_p10 = por %p28_p9, %p27_p8 }
  0x12   :  { %p30_p11 = pnand %p29_p10, %p23_p7 }
  0x14   :  { %33 = shalt.err (!%p30_p11)  }
  0x15   :  { %7 = dma.hbm_to_vmem [thread:$0]  %s2_s8, 768, %s5_s11, [#allocation0] }
  0x16   :  { %35 = dma.done.wait [#allocation0], 768  }
  0x17   :  { %36 = vsyncadd [#allocation0], 4294966528 }
  0x18   :  { %9 = vsyncpa [#allocation0], 1 }

// kernel: custom-call
= control target key start
LH: loop header
LB: loop body
LE: loop exit
PB: predicated region body
PF: predicated region fallthrough
CT: control target
= control target key end

     0   :  { %2 = vsyncpa [#allocation0], 0  ;;  %s61_s0 = inlined_call_operand.hbm [shape: c64[1,1,1,3,16,16], index: 0, kind: input, shape index: {}]   ;;  %s62_s1 = inlined_call_operand.vmem [shape: f32[1,1,1,3,16,16], index: 1, kind: output, shape index: {}]  }
   0x1   :  { %s3_s8 = sshll.u32 %s62_s1, 4  ;;  %s9_s11 = scalar_lea.hbm %s61_s0, 768  ;;  %s4_s8 = int_to_ptr.vmem [resolvable:$true] %s3_s8 }
   0x2   :  { %p10_p0 = scmp.ne.s32.totalorder %s61_s0, %s9_s11  ;;  %s11_s16 = scalar_lea.hbm %s61_s0, 1536 }
   0x3   :  { %p12_p1 = scmp.lt.u32.totalorder %s11_s16, %s9_s11  ;;  %p13_p2 = scmp.lt.u32.totalorder %s9_s11, %s61_s0 }
   0x5   :  { %p14_p3 = por %p13_p2, %p12_p1 }
   0x7   :  { %p15_p4 = pnand %p14_p3, %p10_p0 }
   0x9   :  { %18 = shalt.err (!%p15_p4)  }
   0xa   :  { %s19_s1 = scalar_lea.vmem %s4_s8, 768  ;;  %p24_p6 = scmp.lt.s32.totalorder %s4_s8, %s4_s8 }
   0xb   :  { %p20_p5 = scmp.ne.s32.totalorder %s4_s8, %s19_s1  ;;  %p25_p7 = scmp.lt.s32.totalorder %s19_s1, %s19_s1 }
   0xd   :  { %p26_p8 = por %p25_p7, %p24_p6 }
   0xf   :  { %p27_p9 = pnand %p26_p8, %p20_p5 }
  0x11   :  { %30 = shalt.err (!%p27_p9)  }
  0x12   :  { %6 = dma.hbm_to_vmem [thread:$0]  %s61_s0, 768, %s4_s8, [#allocation0] }
  0x13   :  { %31 = dma.done.wait [#allocation0], 768  }
  0x14   :  { %32 = vsyncadd [#allocation0], 4294966528 }
  0x15   :  { %8 = vsyncpa [#allocation0], 1 }

// kernel: _forward_jit.1
= control target key start
LH: loop header
LB: loop body
LE: loop exit
PB: predicated region body
PF: predicated region fallthrough
CT: control target
= control target key end

     0   :  { %19 = vsyncpa [#allocation4], 0  ;;  %s5028_s0 = inlined_call_operand.vmem [shape: f32[2], index: 0, kind: input, shape index: {}]   ;;  %s5029_s1 = inlined_call_operand.vmem [shape: f32[16,128], index: 1, kind: input, shape index: {}]   ;;  %s5030_s2 = inlined_call_operand.vmem [shape: f32[16,128], index: 2, kind: input, shape index: {}]   ;;  %s5031_s3 = inlined_call_operand.hbm [shape: f32[16,16], index: 3, kind: input, shape index: {}]   ;;  %s5032_s4 = inlined_call_operand.hbm [shape: f32[16,16], index: 4, kind: input, shape index: {}]   ;;  %s5033_s5 = inlined_call_operand.vmem [shape: f32[128,128], index: 5, kind: input, shape index: {}]   ;;  %s5034_s6 = inlined_call_operand.vmem [shape: f32[128,128], index: 6, kind: input, shape index: {}]   ;;  %s5035_s7 = inlined_call_operand.hbm [shape: f32[16,16], index: 7, kind: input, shape index: {}]   ;;  %s5036_s8 = inlined_call_operand.hbm [shape: f32[16,16], index: 8, kind: input, shape index: {}]   ;;  %s5037_s9 = inlined_call_operand.vmem [shape: f32[128,128], index: 9, kind: input, shape index: {}]   ;;  %s5038_s10 = inlined_call_operand.vmem [shape: f32[128,128], index: 10, kind: input, shape index: {}]   ;;  %s5039_s11 = inlined_call_operand.vmem [shape: f32[16,128], index: 11, kind: input, shape index: {}]   ;;  %s5040_s12 = inlined_call_operand.vmem [shape: f32[16,1], index: 12, kind: input, shape index: {}]   ;;  %s5041_s13 = inlined_call_operand.vmem [shape: f32[1,128], index: 13, kind: input, shape index: {}]   ;;  %s5042_s14 = inlined_call_operand.vmem [shape: f32[16,256], index: 14, kind: output, shape index: {}]  }
   0x1   :  { %20 = vsyncpa [#allocation3], 0 }
   0x2   :  { %21 = vsyncpa [#allocation7], 0 }
   0x3   :  { %22 = vsyncpa [#allocation10], 0  ;;  %s29_s15 = sshll.u32 %s5028_s0, 4  ;;  %s3991_s16 = smov [#allocation6]   ;;  %s30_s15 = int_to_ptr.vmem [resolvable:$true] %s29_s15 }
   0x4   :  { %s54_s17 = sshll.u32 %s3991_s16, 4  ;;  %s3883_s20 = scalar_lea.hbm %s5032_s4, 256  ;;  %s55_s17 = int_to_ptr.vmem [resolvable:$true] %s54_s17 }
   0x5   :  { %p3884_p0 = scmp.ne.s32.totalorder %s5032_s4, %s3883_s20  ;;  %p3887_p1 = scmp.lt.u32.totalorder %s3883_s20, %s5032_s4 }
   0x7   :  { %p3889_p2 = pnand %p3887_p1, %p3884_p0 }
   0x9   :  { %3892 = shalt.err (!%p3889_p2)
}
   0xa   :  { %s3893_s25 = scalar_lea.vmem %s55_s17, 256  ;;  %p3898_p4 = scmp.lt.s32.totalorder %s55_s17, %s55_s17 }
   0xb   :  { %p3894_p3 = scmp.ne.s32.totalorder %s55_s17, %s3893_s25  ;;  %p3899_p5 = scmp.lt.s32.totalorder %s3893_s25, %s3893_s25 }
   0xd   :  { %p3900_p6 = por %p3899_p5, %p3898_p4 }
   0xf   :  { %p3901_p7 = pnand %p3900_p6, %p3894_p3 }
  0x11   :  { %3904 = shalt.err (!%p3901_p7)
}
  0x12   :  { %s3992_s0 = smov 128   ;;  %s3993_s26 = smov 8  }
  0x13   :  { %60 = dma.hbm_to_vmem [thread:$0]  %s5032_s4, 256, %s55_s17, [#allocation7], %s3992_s0, %s3992_s0, %s3993_s26  }
  0x14   :  { %s3905_s29 = scalar_lea.vmem %s30_s15, 16  ;;  %p3910_p9 = scmp.lt.s32.totalorder %s30_s15, %s30_s15 }
  0x15   :  { %p3906_p8 = scmp.ne.s32.totalorder %s30_s15, %s3905_s29  ;;  %p3911_p10 = scmp.lt.s32.totalorder %s3905_s29, %s3905_s29 }
  0x17   :  { %p3912_p11 = por %p3911_p10, %p3910_p9 }
  0x19   :  { %p3913_p12 = pnand %p3912_p11, %p3906_p8 }
  0x1b   :  { %3916 = shalt.err (!%p3913_p12)
}
  0x1c   :  { %s3994_s30 = smov [#allocation2]   ;;  %s3995_s16 = smov [#allocation5]  }
  0x1d   :  { %32 = dma.vmem_to_smem %s30_s15, 16, %s3994_s30, [#allocation4]  }
  0x1e   :  { %s42_s18 = sshll.u32 %s3995_s16, 4  ;;  %s3996_s19 = smov [#allocation8]   ;;  %s43_s18 = int_to_ptr.vmem [resolvable:$true] %s42_s18 }
  0x1f   :  { %s70_s20 = sshll.u32 %s3996_s19, 4  ;;  %s3917_s4 = scalar_lea.hbm %s5031_s3, 256  ;;  %s4101_s20 = int_to_ptr.vmem [resolvable:$true] %s70_s20 }
  0x20   :  { %p3918_p13 = scmp.ne.s32.totalorder %s5031_s3, %s3917_s4  ;;  %p3921_p0 = scmp.lt.u32.totalorder %s3917_s4, %s5031_s3 }
  0x22   :  { %p3923_p1 = pnand %p3921_p0, %p3918_p13 }
  0x24   :  { %3926 = shalt.err (!%p3923_p1)
}
  0x25   :  { %s3927_s15 = scalar_lea.vmem %s43_s18, 256  ;;  %p3932_p3 = scmp.lt.s32.totalorder %s43_s18, %s43_s18 }
  0x26   :  { %p3928_p2 = scmp.ne.s32.totalorder %s43_s18, %s3927_s15  ;;  %p3933_p4 = scmp.lt.s32.totalorder %s3927_s15, %s3927_s15 }
  0x28   :  { %p3934_p5 = por %p3933_p4, %p3932_p3 }
  0x2a   :  { %p3935_p6 = pnand %p3934_p5, %p3928_p2 }
  0x2c   :  { %3938 = shalt.err (!%p3935_p6)
}
  0x2d   :  { %48 = dma.hbm_to_vmem [thread:$0]  %s5031_s3, 256, %s43_s18, [#allocation3], %s3992_s0, %s3992_s0, %s3993_s26  }
  0x2e   :  { %s3939_s16 = scalar_lea.hbm %s5035_s7, 256 }
  0x2f   :  { %p3940_p7 = scmp.ne.s32.totalorder %s5035_s7, %s3939_s16  ;;  %p3943_p8 = scmp.lt.u32.totalorder %s3939_s16, %s5035_s7 }
  0x31   :  { %p3945_p9 = pnand %p3943_p8, %p3940_p7 }
  0x33   :  { %3948 = shalt.err (!%p3945_p9)
}
  0x34   :  { %s3949_s17 = scalar_lea.vmem %s4101_s20, 256  ;;  %p3954_p11 = scmp.lt.s32.totalorder %s4101_s20, %s4101_s20 }
  0x35   :  { %p3950_p10 = scmp.ne.s32.totalorder %s4101_s20, %s3949_s17  ;;  %p3955_p12 = scmp.lt.s32.totalorder %s3949_s17, %s3949_s17 }
  0x37   :  { %p3956_p13 = por %p3955_p12, %p3954_p11 }
  0x39   :  { %p3957_p0 = pnand %p3956_p13, %p3950_p10 }
  0x3b   :  { %3960 = shalt.err (!%p3957_p0)
}
  0x3c   :  { %76 = dma.hbm_to_vmem [thread:$0]  %s5035_s7, 256, %s4101_s20, [#allocation7], %s3992_s0, %s3992_s0, %s3993_s26  }
  0x3d   :  { %s3997_s23 = smov [#allocation9]   ;;  %s3961_s27 = scalar_lea.hbm %s5036_s8, 256 }
  0x3e   :  { %s82_s24 = sshll.u32 %s3997_s23, 4  ;;  %p3962_p1 = scmp.ne.s32.totalorder %s5036_s8, %s3961_s27  ;;  %s83_s24 = int_to_ptr.vmem [resolvable:$true] %s82_s24 }
  0x3f   :  { %p3965_p2 = scmp.lt.u32.totalorder %s3961_s27, %s5036_s8 }
  0x41   :  { %p3967_p3 = pnand %p3965_p2, %p3962_p1 }
  0x43   :  { %3970 = shalt.err (!%p3967_p3)
}
  0x44   :  { %s3971_s19 = scalar_lea.vmem %s83_s24, 256  ;;  %p3976_p5 = scmp.lt.s32.totalorder %s83_s24, %s83_s24 }
  0x45   :  { %p3972_p4 = scmp.ne.s32.totalorder %s83_s24, %s3971_s19  ;;  %p3977_p6 = scmp.lt.s32.totalorder %s3971_s19, %s3971_s19 }
  0x47   :  { %p3978_p7 = por %p3977_p6, %p3976_p5 }
  0x49   :  { %p3979_p8 = pnand %p3978_p7, %p3972_p4 }
  0x4b   :  { %3982 = shalt.err (!%p3979_p8)
}
  0x4c   :  { %88 = dma.hbm_to_vmem [thread:$0]  %s5036_s8, 256, %s83_s24, [#allocation10], %s3992_s0, %s3992_s0, %s3993_s26  }
  0x4d   :  { %3983 = dma.done.wait [#allocation4], 16  }
  0x4e   :  { %3984 = vsyncadd [#allocation4], 4294967280 }
  0x4f   :  { %3985 = dma.done.wait [#allocation3], 256  }
  0x50   :  { %3986 = vsyncadd [#allocation3], 4294967040 }
  0x51   :  { %3987 = dma.done.wait [#allocation7], 512  }
  0x52   :  { %3988 = vsyncadd [#allocation7], 4294966784 }
  0x53   :  { %3989 = dma.done.wait [#allocation10], 256  }
  0x54   :  { %3990 = vsyncadd [#allocation10], 4294967040 }
  0x55   :  { %114 = sfence }
  0x56   :  { %v115_v0 = vld [vmem:[%s5029_s1] sm:$0xff]  ;;  %v116_v1 = vld [vmem:[%s5029_s1 + $0x8] sm:$0xff]  ;;  %vm123_vm0 = vcmask 130048   ;;  %v440_v9 = vld [vmem:[%s5033_s5 + $0x10] sm:$0xff]  ;;  %v3998_v55 = vmov 683565275  }
  0x57   :  { %v119_v2 = vld [vmem:[#allocation5] sm:$0xff]  ;;  %v3512_v3 = vpack.c.bf16 %v116_v1, %v115_v0  ;;  %v118_v5 = vld [vmem:[%s5030_s2 + $0x8] sm:$0xff]  ;;  %v441_v10 = vld [vmem:[%s5033_s5 + $0x18] sm:$0xff]  ;;  %v3999_v57 = vmov 2102212464  }
  0x58   :  { %3180 = vmatprep.mubr.msk.f32.mxu1 %vm123_vm0, %v119_v2  ;;  %v117_v4 = vld [vmem:[%s5030_s2] sm:$0xff]  ;;  %v439_v8 = vld [vmem:[%s5033_s5 + $0x8] sm:$0xff]  ;;  %v121_v13 = vld [vmem:[#allocation6] sm:$0xff]  ;;  %v3532_v14 = vpack.c.bf16 %v441_v10, %v440_v9  ;;  %v4000_v59 = vmov 2475754826  }
  0x59   :  { %v3516_v6 = vpack.c.bf16 %v118_v5, %v117_v4  ;;  %v438_v7 = vld [vmem:[%s5033_s5] sm:$0xff]  ;;  %3513 = vmatprep.subr.bf16.mxu1 %v3512_v3  ;;  %v120_v11 = vld [vmem:[#allocation5 + $0x8] sm:$0xff]  ;;  %v122_v17 = vld [vmem:[#allocation6 + $0x8] sm:$0xff]  ;;  %v4001_v62 = vmov 2131351028  }
  0x5a   :  { %3515 = vmatpush3.bf16.msra.mxu1 %v3512_v3  ;;  %v3528_v12 = vpack.c.bf16 %v439_v8, %v438_v7  ;;  %v442_v15 = vld [vmem:[%s5033_s5 + $0x20] sm:$0xff]  ;;  %v443_v16 = vld [vmem:[%s5033_s5 + $0x28] sm:$0xff]  ;;  %v444_v19 = vld [vmem:[%s5033_s5 + $0x30] sm:$0xff]  ;;  %v4003_v7 = vmov 0  }
  0x5b   :  { %3517 = vmatprep.subr.bf16.mxu1 %v3516_v6  ;;  %v3536_v18 = vpack.c.bf16 %v443_v16, %v442_v15  ;;  %v445_v20 = vld [vmem:[%s5033_s5 + $0x38] sm:$0xff]  ;;  %v446_v22 = vld [vmem:[%s5033_s5 + $0x40] sm:$0xff]  ;;  %v447_v23 = vld [vmem:[%s5033_s5 + $0x48] sm:$0xff]  ;;  %3850 = vset.pattern.permute.xlu1 %v4003_v7 }
  0x5c   :  { %3529 = vmatprep.subr.bf16.mxu0 %v3528_v12  ;;  %v3540_v21 = vpack.c.bf16 %v445_v20, %v444_v19  ;;  %v3544_v24 = vpack.c.bf16 %v447_v23, %v446_v22  ;;  %v448_v25 = vld [vmem:[%s5033_s5 + $0x50] sm:$0xff]  ;;  %v449_v26 = vld [vmem:[%s5033_s5 + $0x58] sm:$0xff]  ;;  %v450_v28 = vld [vmem:[%s5033_s5 + $0x60] sm:$0xff]  ;;  %3849 = vset.pattern.permute.xlu0 %v4003_v7 }
  0x5d   :  { %3181 = vmatmul.mubr.msk.f32.vlgmr.msra.gmra.mrb[0].mxu1 %vm123_vm0, %v120_v11  ;;  %3531 = vmatpush3.bf16.msra.mxu0 %v3528_v12  ;;  %v3548_v27 = vpack.c.bf16 %v449_v26, %v448_v25  ;;  %v451_v29 = vld [vmem:[%s5033_s5 + $0x68] sm:$0xff]  ;;  %v452_v31 = vld [vmem:[%s5033_s5 + $0x70] sm:$0xff]  ;;  %v453_v32 = vld [vmem:[%s5033_s5 + $0x78] sm:$0xff]  ;;  %s2967_s5 = sld [smem:[#allocation2 + $0x1]] }
  0x5e   :  { %3519 = vmatpush3.bf16.msra.mxu1 %v3516_v6  ;;  %3187 = vmatprep.mubr.msk.f32.mxu1 %vm123_vm0, %v121_v13  ;;  %v3552_v30 = vpack.c.bf16 %v451_v29, %v450_v28  ;;  %v3556_v33 = vpack.c.bf16 %v453_v32, %v452_v31  ;;  %v454_v34 = vld [vmem:[%s5034_s6] sm:$0xff]  ;;  %v455_v35 = vld [vmem:[%s5034_s6 + $0x8] sm:$0xff] }
  0x5f   :  { %3521 = vmatprep.subr.bf16.mxu1 %v3512_v3  ;;  %3533 = vmatprep.subr.bf16.mxu0 %v3532_v14  ;;  %v4227_v36 = vpack.c.bf16 %v455_v35, %v454_v34  ;;  %v4234_v37 = vld [vmem:[%s5040_s12] sm:$0xff]  ;;  %v4246_v41 = vld [vmem:[%s5040_s12 + $0x8] sm:$0xff]  ;;  %s4262_s12 = sld [smem:[#allocation2]] }
  0x61   :  { %3188 = vmatmul.mubr.msk.f32.vlgmr.msra.gmra.mrb[2].mxu1 %vm123_vm0, %v122_v17  ;;  %3535 = vmatpush3.bf16.msra.mxu0 %v3532_v14 }
  0x62   :  { %3523 = vmatpush3.bf16.msra.mxu1 %v3512_v3  ;;  %3194 = vmatprep.mubr.msk.f32.mxu1 %vm123_vm0, %v121_v13 }
  0x63   :  { %3525 = vmatprep.subr.bf16.mxu1 %v3516_v6  ;;  %3537 = vmatprep.subr.bf16.mxu0 %v3536_v18  ;;  %v4236_v38 = vstv %s2967_s5 }
  0x64   :  { %v4240_v39 = vmul.f32 %v4236_v38, %v4234_v37  ;;  %v4250_v43 = vmul.f32 %v4236_v38, %v4246_v41 }
  0x65   :  { %3195 = vmatmul.mubr.msk.f32.vlgmr.msra.gmra.mrb[4].mxu1 %vm123_vm0, %v122_v17  ;;  %3539 = vmatpush3.bf16.msra.mxu0 %v3536_v18  ;;  %v4276_v26 = vstv %s4262_s12 }
  0x66   :  { %3527 = vmatpush3.bf16.msra.mxu1 %v3516_v6  ;;  %3201 = vmatprep.mubr.msk.f32.mxu1 %vm123_vm0, %v119_v2  ;;  %v1470_v40 = vand.u32 2139095040, %v4240_v39  ;;  %v1573_v45 = vand.u32 2139095040, %v4250_v43  ;;  %v1467_v52 = vand.u32 2147483647, %v4240_v39  ;;  %v4002_v2 = vmov 920167782  }
  0x67   :  { %3593 = vmatprep.subr.bf16.mxu1 %v3528_v12  ;;  %3541 = vmatprep.subr.bf16.mxu0 %v3540_v21  ;;  %v4290_v35 = vmul.f32 %v4276_v26, %v4246_v41  ;;  %vm1469_vm14 = vcmp.lt.s32.totalorder %v4240_v39, 0 }
  0x68   :  { %v1471_v42 = vshrl.u32 %v1470_v40, 23  ;;  %v1574_v47 = vshrl.u32 %v1573_v45, 23  ;;  %v1474_v53 = vand.u32 8388607, %v1467_v52  ;;  %v1570_v45 = vand.u32 2147483647, %v4250_v43 }
  0x69   :  { %3543 = vmatpush3.bf16.msra.mxu0 %v3540_v21 }
  0x6a   :  { %3545 = vmatprep.subr.bf16.mxu0 %v3544_v24  ;;  %v2968_v44 = vadd.s32 4294967169, %v1471_v42  ;;  %v2972_v51 = vadd.s32 4294967169, %v1574_v47  ;;  %v1475_v4 = vor.u32 8388608, %v1474_v53 }
  0x6c   :  { %v1477_v46 = vadd.s32 1, %v2968_v44  ;;  %v1515_v19 = vshll.u32 %v1475_v4, 8 }
  0x6d   :  { %3202 = vmatmul.mubr.msk.f32.vlgmr.msra.gmra.mrb[4].mxu1 %vm123_vm0, %v120_v11  ;;  %3547 = vmatpush3.bf16.msra.mxu0 %v3544_v24 }
  0x6e   :  { %3595 = vmatpush3.bf16.msra.mxu1 %v3528_v12  ;;  %3549 = vmatprep.subr.bf16.mxu0 %v3548_v27  ;;  %vm1478_vm1 = vcmp.gt.s32.totalorder %v1477_v46, 0  ;;  %v4004_v12 = vmov 1326507024  }
  0x6f   :  { %3597 = vmatprep.subr.bf16.mxu1 %v3532_v14  ;;  %v1479_v48 = vsel %vm1478_vm1, %v1477_v46, 0  ;;  %vm4348_vm1 = vcmp.le.f32.partialorder %v1467_v52, 0.7853982 }
  0x70   :  { %v1481_v49 = vand.u32 31, %v1479_v48  ;;  %v1480_v54 = vshrl.u32 %v1479_v48, 5 }
  0x71   :  { %3551 = vmatpush3.bf16.msra.mxu0 %v3548_v27 }
  0x72   :  { %3599 = vmatpush3.bf16.msra.mxu1 %v3532_v14  ;;  %3553 = vmatprep.subr.bf16.mxu0 %v3552_v30  ;;  %v1482_v50 = vsub.s32 32, %v1481_v49  ;;  %v1484_v56 = vshll.u32 %v3998_v55, %v1481_v49  ;;  %v1493_v58 = vshll.u32 %v3999_v57, %v1481_v49  ;;  %v1487_v61 = vshll.u32 %v4000_v59, %v1481_v49 }
  0x73   :  { %3601 = vmatprep.subr.bf16.mxu1 %v3536_v18  ;;  %v1490_v0 = vshll.u32 %v4001_v62, %v1481_v49  ;;  %v1496_v6 = vshll.u32 %v4002_v2, %v1481_v49  ;;  %vm1499_vm2 = vcmp.lt.s32.totalorder %v1480_v54, 1  ;;  %vm1501_vm3 = vcmp.lt.s32.totalorder %v1480_v54, 3 }
  0x74   :  { %v1485_v60 = vshrl.u32 %v4000_v59, %v1482_v50  ;;  %v1488_v63 = vshrl.u32 %v4001_v62, %v1482_v50  ;;  %v1491_v1 = vshrl.u32 %v3999_v57, %v1482_v50  ;;  %v1494_v3 = vshrl.u32 %v4002_v2, %v1482_v50 }
  0x75   :  { %3555 = vmatpush3.bf16.msra.mxu0 %v3552_v30  ;;  %v1483_v5 = vshrl.u32 %v3998_v55, %v1482_v50  ;;  %v1497_v13 = vshrl.u32 %v4004_v12, %v1482_v50  ;;  %v1580_v14 = vadd.s32 1, %v2972_v51  ;;  %vm1500_vm4 = vcmp.lt.s32.totalorder %v1480_v54, 2 }
  0x76   :  { %3603 = vmatpush3.bf16.msra.mxu1 %v3536_v18  ;;  %3557 = vmatprep.subr.bf16.mxu0 %v3556_v33  ;;  %v1486_v8 = vor.u32 %v1485_v60, %v1484_v56  ;;  %v1489_v9 = vor.u32 %v1488_v63, %v1487_v61  ;;  %v1492_v10 = vor.u32 %v1491_v1, %v1490_v0  ;;  %vm1502_vm5 = vcmp.lt.s32.totalorder %v1480_v54, 4 }
  0x77   :  { %3605 = vmatprep.subr.bf16.mxu1 %v3540_v21  ;;  %v1495_v11 = vor.u32 %v1494_v3, %v1493_v58  ;;  %v1498_v16 = vor.u32 %v1497_v13, %v1496_v6  ;;  %vm1581_vm6 = vcmp.gt.s32.totalorder %v1580_v14, 0  ;;  %v891_v50 = vand.u32 2139095040, %v4290_v35 }
  0x78   :  { %v1507_v15 = vsel %vm1499_vm2, %v1486_v8, %v1489_v9  ;;  %v1504_v17 = vsel %vm1502_vm5, %v1492_v10, 2102212464  ;;  %v1503_v20 = vsel %vm1499_vm2, %v1483_v5, %v1486_v8  ;;  %v1511_v23 = vsel %vm1499_vm2, %v1489_v9, %v1492_v10 }
  0x79   :  { %3559 = vmatpush3.bf16.msra.mxu0 %v3556_v33  ;;  %v1508_v18 = vsel %vm1502_vm5, %v1495_v11, 920167782  ;;  %v1512_v25 = vsel %vm1502_vm5, %v1498_v16, 1326507024  ;;  %v1582_v34 = vsel %vm1581_vm6, %v1580_v14, 0 }
  0x7a   :  { %3607 = vmatpush3.bf16.msra.mxu1 %v3540_v21  ;;  %3561 = vmatprep.subr.bf16.mxu0 %v4227_v36  ;;  %v1505_v21 = vsel %vm1501_vm3, %v1489_v9, %v1504_v17  ;;  %v1509_v22 = vsel %vm1501_vm3, %v1492_v10, %v1508_v18  ;;  %v1584_v40 = vand.u32 31, %v1582_v34  ;;  %v1583_v48 = vshrl.u32 %v1582_v34, 5 }
  0x7b   :  { %3609 = vmatprep.subr.bf16.mxu1 %v3544_v24  ;;  %v1577_v63 = vand.u32 8388607, %v1570_v45 }
  0x7c   :  { %v1585_v46 = vsub.s32 32, %v1584_v40  ;;  %v1587_v47 = vshll.u32 %v3998_v55, %v1584_v40  ;;  %v1590_v49 = vshll.u32 %v4000_v59, %v1584_v40  ;;  %v1593_v53 = vshll.u32 %v4001_v62, %v1584_v40 }
  0x7d   :  { %v1596_v54 = vshll.u32 %v3999_v57, %v1584_v40  ;;  %v1599_v1 = vshll.u32 %v4002_v2, %v1584_v40  ;;  %vm1602_vm8 = vcmp.lt.s32.totalorder %v1583_v48, 1  ;;  %vm1604_vm9 = vcmp.lt.s32.totalorder %v1583_v48, 3 }
  0x7e   :  { %3611 = vmatpush3.bf16.msra.mxu1 %v3544_v24  ;;  %v1510_v24 = vsel %vm1500_vm4, %v1507_v15, %v1509_v22  ;;  %v1588_v51 = vshrl.u32 %v4000_v59, %v1585_v46  ;;  %v1591_v58 = vshrl.u32 %v4001_v62, %v1585_v46  ;;  %v1594_v60 = vshrl.u32 %v3999_v57, %v1585_v46 }
  0x7f   :  { %3613 = vmatprep.subr.bf16.mxu1 %v3548_v27  ;;  %v4279_v28 = vmul.u32.u64.low %v1515_v19, %v1510_v24  ;;  %v4280_v29 = vmul.u32.u64.high %v1515_v19, %v1510_v24, %v4279_v28  ;;  %v1597_v61 = vshrl.u32 %v4002_v2, %v1585_v46  ;;  %v1600_v3 = vshrl.u32 %v4004_v12, %v1585_v46 }
  0x80   :  { %v1589_v0 = vor.u32 %v1588_v51, %v1587_v47  ;;  %v1586_v5 = vshrl.u32 %v3998_v55, %v1585_v46  ;;  %v1592_v6 = vor.u32 %v1591_v58, %v1590_v49  ;;  %v1595_v7 = vor.u32 %v1594_v60, %v1593_v53  ;;  %v4327_v47 = vld [vmem:[%s5041_s13] sm:$0x1] }
  0x81   :  { %v1525_v44 = vadd.s32 1, %v4280_v29  ;;  %v1598_v8 = vor.u32 %v1597_v61, %v1596_v54  ;;  %v1601_v9 = vor.u32 %v1600_v3, %v1599_v1  ;;  %v1578_v13 = vor.u32 8388608, %v1577_v63 }
  0x82   :  { %3615 = vmatpush3.bf16.msra.mxu1 %v3548_v27  ;;  %v1513_v27 = vsel %vm1501_vm3, %v1495_v11, %v1512_v25  ;;  %v892_v11 = vshrl.u32 %v891_v50, 23  ;;  %vm1603_vm10 = vcmp.lt.s32.totalorder %v1583_v48, 2  ;;  %vm1605_vm11 = vcmp.lt.s32.totalorder %v1583_v48, 4 }
  0x83   :  { %3617 = vmatprep.subr.bf16.mxu1 %v3552_v30  ;;  %v1514_v31 = vsel %vm1500_vm4, %v1511_v23, %v1513_v27  ;;  %v1610_v14 = vsel %vm1602_vm8, %v1589_v0, %v1592_v6  ;;  %v1606_v16 = vsel %vm1602_vm8, %v1586_v5, %v1589_v0  ;;  %v1607_v17 = vsel %vm1605_vm11, %v1595_v7, 2102212464 }
  0x84   :  { %v1611_v18 = vsel %vm1605_vm11, %v1598_v8, 920167782  ;;  %v1615_v22 = vsel %vm1605_vm11, %v1601_v9, 1326507024  ;;  %v1618_v27 = vshll.u32 %v1578_v13, 8  ;;  %v4334_v54 = vmul.f32 %v4276_v26, %v4327_v47 }
  0x85   :  { %v1616_v25 = vsel %vm1604_vm9, %v1598_v8, %v1615_v22  ;;  %v4340_v60 = vmul.f32 %v4276_v26, %v4234_v37 }
  0x86   :  { %3619 = vmatpush3.bf16.msra.mxu1 %v3552_v30  ;;  %v1506_v30 = vsel %vm1500_vm4, %v1503_v20, %v1505_v21  ;;  %v1612_v20 = vsel %vm1604_vm9, %v1595_v7, %v1611_v18  ;;  %v1614_v21 = vsel %vm1602_vm8, %v1592_v6, %v1595_v7  ;;  %vm1559_vm8 = vweird.f32 %v4240_v39 }
  0x87   :  { %3621 = vmatprep.subr.bf16.mxu1 %v3556_v33  ;;  %v1522_v42 = vmul.u32 %v1515_v19, %v1506_v30  ;;  %v1613_v24 = vsel %vm1603_vm10, %v1610_v14, %v1612_v20  ;;  %v788_v26 = vand.u32 2139095040, %v4340_v60 }
  0x8a   :  { %3623 = vmatpush3.bf16.msra.mxu1 %v3556_v33  ;;  %v4285_v32 = vmul.u32.u64.low %v1515_v19, %v1514_v31  ;;  %v4286_v33 = vmul.u32.u64.high %v1515_v19, %v1514_v31, %v4285_v32  ;;  %v1608_v19 = vsel %vm1604_vm9, %v1592_v6, %v1607_v17  ;;  %vm4428_vm9 = vcmp.le.f32.partialorder %v1570_v45, 0.7853982 }
  0x8b   :  { %3625 = vmatprep.subr.bf16.mxu1 %v4227_v36  ;;  %v1609_v31 = vsel %vm1603_vm10, %v1606_v16, %v1608_v19  ;;  %v1617_v32 = vsel %vm1603_vm10, %v1614_v21, %v1616_v25 }
  0x8c   :  { %vm1524_vm7 = vc.u32 %v4286_v33, %v4279_v28  ;;  %v4317_v34 = vmul.u32.u64.low %v1618_v27, %v1617_v32  ;;  %v4318_v40 = vmul.u32.u64.high %v1618_v27, %v1617_v32, %v4317_v34  ;;  %v1523_v61 = vadd.s32 %v4279_v28, %v4286_v33 }
  0x8d   :  { %v1526_v41 = vsel %vm1524_vm7, %v1525_v44, %v4280_v29  ;;  %v2947_v29 = vadd.s32 4294967169, %v892_v11  ;;  %v888_v11 = vand.u32 2147483647, %v4290_v35  ;;  %v789_v32 = vshrl.u32 %v788_v26, 23 }
  0x8e   :  { %v1527_v56 = vadd.s32 %v1526_v41, %v1522_v42  ;;  %v4320_v42 = vmul.u32.u64.low %v1618_v27, %v1613_v24  ;;  %v4321_v44 = vmul.u32.u64.high %v1618_v27, %v1613_v24, %v4320_v42  ;;  %v1625_v41 = vmul.u32 %v1618_v27, %v1609_v31 }
  0x8f   :  { %v898_v49 = vadd.s32 1, %v2947_v29  ;;  %v895_v31 = vand.u32 8388607, %v888_v11  ;;  %vm1572_vm7 = vcmp.lt.s32.totalorder %v4250_v43, 0 }
  0x90   :  { %v1528_v4 = vadd.s32 536870912, %v1527_v56  ;;  %vm1627_vm12 = vc.u32 %v4318_v40, %v4320_v42  ;;  %v1628_v48 = vadd.s32 1, %v4321_v44 }
  0x91   :  { %vm899_vm13 = vcmp.gt.s32.totalorder %v898_v49, 0 }
  0x92   :  { %v1529_v10 = vshrl.u32 %v1528_v4, 30  ;;  %v900_v58 = vsel %vm899_vm13, %v898_v49, 0 }
  0x93   :  { %v902_v0 = vand.u32 31, %v900_v58  ;;  %v4358_v13 = vshrl.u32 %v900_v58, 5 }
  0x94   :  { %v1530_v15 = vshll.u32 %v1529_v10, 30  ;;  %v1553_v51 = vsub.s32 4, %v1529_v10 }
  0x95   :  { %v903_v37 = vsub.s32 32, %v902_v0  ;;  %v905_v14 = vshll.u32 %v3998_v55, %v902_v0  ;;  %v908_v52 = vshll.u32 %v4000_v59, %v902_v0  ;;  %v911_v18 = vshll.u32 %v4001_v62, %v902_v0 }
  0x96   :  { %v1531_v23 = vsub.s32 %v1527_v56, %v1530_v15  ;;  %v1629_v56 = vsel %vm1627_vm12, %v1628_v48, %v4321_v44  ;;  %v1554_v3 = vsel %vm1469_vm14, %v1553_v51, %v1529_v10  ;;  %v914_v21 = vshll.u32 %v3999_v57, %v902_v0 }
  0x97   :  { %v1630_v63 = vadd.s32 %v1629_v56, %v1625_v41  ;;  %v1556_v10 = vsel %vm4348_vm1, 0, %v1554_v3  ;;  %v906_v19 = vshrl.u32 %v4000_v59, %v903_v37  ;;  %v909_v20 = vshrl.u32 %v4001_v62, %v903_v37 }
  0x98   :  { %v1533_v30 = vsub.s32 0, %v1531_v23  ;;  %v915_v22 = vshrl.u32 %v4002_v2, %v903_v37  ;;  %v912_v27 = vshrl.u32 %v3999_v57, %v903_v37  ;;  %v1766_v29 = vadd.s32 3, %v1556_v10 }
  0x99   :  { %v1631_v7 = vadd.s32 536870912, %v1630_v63  ;;  %v918_v49 = vshrl.u32 %v4004_v12, %v903_v37  ;;  %v907_v41 = vor.u32 %v906_v19, %v905_v14  ;;  %v910_v51 = vor.u32 %v909_v20, %v908_v52 }
  0x9a   :  { %v2969_v46 = vmin.u32 %v1533_v30, %v1531_v23  ;;  %v4371_v30 = vand.u32 3, %v1556_v10  ;;  %v916_v48 = vor.u32 %v915_v22, %v914_v21  ;;  %v913_v58 = vor.u32 %v912_v27, %v911_v18 }
  0x9b   :  { %v4353_v9 = vshrl.u32 %v1631_v7, 30  ;;  %vm920_vm2 = vcmp.lt.s32.totalorder %v4358_v13, 1  ;;  %vm922_vm3 = vcmp.lt.s32.totalorder %v4358_v13, 3  ;;  %vm923_vm4 = vcmp.lt.s32.totalorder %v4358_v13, 4 }
  0x9c   :  { %v1535_v50 = vclz %v2969_v46  ;;  %v917_v46 = vshll.u32 %v4002_v2, %v902_v0  ;;  %vm921_vm5 = vcmp.lt.s32.totalorder %v4358_v13, 2  ;;  %v932_v10 = vsel %vm920_vm2, %v910_v51, %v913_v58 }
  0x9d   :  { %v1633_v17 = vshll.u32 %v4353_v9, 30  ;;  %vm1561_vm10 = vcmp.lt.s32.totalorder %v4371_v30, 2  ;;  %vm1562_vm11 = vcmp.eq.s32.totalorder %v4371_v30, 0 }
  0x9e   :  { %v2970_v53 = vadd.s32 4294967294, %v1535_v50  ;;  %v904_v50 = vshrl.u32 %v3998_v55, %v903_v37  ;;  %v919_v3 = vor.u32 %v918_v49, %v917_v46  ;;  %v1767_v46 = vand.u32 3, %v1766_v29 }
  0x9f   :  { %v4368_v25 = vsub.s32 %v1630_v63, %v1633_v17  ;;  %v896_v63 = vor.u32 8388608, %v895_v31 }
  0xa0   :  { %vm2971_vm15 = vcmp.lt.s32.totalorder %v2970_v53, 0 }
  0xa1   :  { %v1538_v1 = vsel %vm2971_vm15, 0, %v2970_v53  ;;  %v1636_v44 = vsub.s32 0, %v4368_v25  ;;  %v936_v14 = vshll.u32 %v896_v63, 8  ;;  %vm1768_vm15 = vcmp.lt.s32.totalorder %v1767_v46, 2 }
  0xa2   :  { %v1539_v4 = vsub.s32 32, %v1538_v1  ;;  %v1540_v5 = vshll.u32 %v1531_v23, %v1538_v1  ;;  %v1543_v6 = vsub.s32 4294967266, %v1538_v1 }
  0xa3   :  { %v2973_v56 = vmin.u32 %v1636_v44, %v4368_v25  ;;  %v2943_v44 = vadd.s32 4294967169, %v789_v32 }
  0xa4   :  { %v1541_v28 = vshrl.u32 %v1523_v61, %v1539_v4  ;;  %v1544_v33 = vadd.s32 127, %v1543_v6  ;;  %v1626_v61 = vadd.s32 %v4320_v42, %v4318_v40  ;;  %v924_v4 = vsel %vm920_vm2, %v904_v50, %v907_v41 }
  0xa5   :  { %v1638_v1 = vclz %v2973_v56  ;;  %v928_v6 = vsel %vm920_vm2, %v907_v41, %v910_v51  ;;  %v929_v40 = vsel %vm923_vm4, %v916_v48, 920167782  ;;  %vm1769_vm2 = vcmp.eq.s32.totalorder %v1767_v46, 0 }
  0xa6   :  { %v1542_v15 = vor.u32 %v1541_v28, %v1540_v5  ;;  %v1545_v16 = vshll.u32 %v1544_v33, 23  ;;  %v925_v5 = vsel %vm923_vm4, %v913_v58, 2102212464  ;;  %v930_v26 = vsel %vm922_vm3, %v913_v58, %v929_v40 }
  0xa7   :  { %v2974_v7 = vadd.s32 4294967294, %v1638_v1  ;;  %v926_v37 = vsel %vm922_vm3, %v910_v51, %v925_v5  ;;  %v1656_v33 = vsub.s32 4, %v4353_v9  ;;  %v931_v52 = vsel %vm921_vm5, %v928_v6, %v930_v26 }
  0xa8   :  { %v1546_v23 = vor.u32 4788187, %v1545_v16  ;;  %v1549_v24 = vcvt.s32.f32 %v1542_v15  ;;  %v933_v15 = vsel %vm923_vm4, %v919_v3, 1326507024  ;;  %v927_v8 = vsel %vm921_vm5, %v924_v4, %v926_v37 }
  0xa9   :  { %vm2975_vm6 = vcmp.lt.s32.totalorder %v2974_v7, 0  ;;  %v934_v17 = vsel %vm922_vm3, %v916_v48, %v933_v15  ;;  %v943_v41 = vmul.u32 %v936_v14, %v927_v8  ;;  %v795_v51 = vadd.s32 1, %v2943_v44 }
  0xaa   :  { %v1547_v34 = vand.u32 2147483647, %v1546_v23  ;;  %v1641_v16 = vsel %vm2975_vm6, 0, %v2974_v7  ;;  %v935_v21 = vsel %vm921_vm5, %v932_v10, %v934_v17 }
  0xab   :  { %v1642_v18 = vsub.s32 32, %v1641_v16  ;;  %v1643_v19 = vshll.u32 %v4368_v25, %v1641_v16  ;;  %v1646_v20 = vsub.s32 4294967266, %v1641_v16  ;;  %v1657_v25 = vsel %vm1572_vm7, %v1656_v33, %v4353_v9 }
  0xac   :  { %v1550_v53 = vmul.f32 %v1549_v24, %v1547_v34  ;;  %v4417_v22 = vmul.u32.u64.low %v936_v14, %v935_v21  ;;  %v4418_v23 = vmul.u32.u64.high %v936_v14, %v935_v21, %v4417_v22  ;;  %v1659_v48 = vsel %vm4428_vm9, 0, %v1657_v25 }
  0xad   :  { %v4420_v24 = vmul.u32.u64.low %v936_v14, %v931_v52  ;;  %v4421_v27 = vmul.u32.u64.high %v936_v14, %v931_v52, %v4420_v24  ;;  %v1644_v31 = vshrl.u32 %v1626_v61, %v1642_v18  ;;  %v1647_v34 = vadd.s32 127, %v1646_v20 }
  0xae   :  { %v1551_v0 = vxor.u32 2147483648, %v1550_v53  ;;  %vm796_vm13 = vcmp.gt.s32.totalorder %v795_v51, 0  ;;  %v1870_v3 = vadd.s32 3, %v1659_v48  ;;  %v4445_v40 = vand.u32 3, %v1659_v48 }
  0xaf   :  { %v1645_v49 = vor.u32 %v1644_v31, %v1643_v19  ;;  %v1648_v50 = vshll.u32 %v1647_v34, 23  ;;  %vm945_vm12 = vc.u32 %v4418_v23, %v4420_v24  ;;  %v946_v45 = vadd.s32 1, %v4421_v27 }
  0xb0   :  { %v1552_v42 = vsel %vm1469_vm14, %v1551_v0, %v1550_v53  ;;  %vm1565_vm14 = vcmp.eq.s32.totalorder %v4371_v30, 2  ;;  %v785_v53 = vand.u32 2147483647, %v4340_v60  ;;  %v797_v56 = vsel %vm796_vm13, %v795_v51, 0 }
  0xb1   :  { %v1555_v28 = vsel %vm4348_vm1, %v4240_v39, %v1552_v42  ;;  %v1649_v29 = vor.u32 4788187, %v1648_v50  ;;  %v1652_v32 = vcvt.s32.f32 %v1645_v49  ;;  %v947_v9 = vsel %vm945_vm12, %v946_v45, %v4421_v27 }
  0xb2   :  { %3851 = vcosq.f32 %v1555_v28  ;;  %vm1772_vm1 = vcmp.eq.s32.totalorder %v1767_v46, 2  ;;  %v948_v63 = vadd.s32 %v947_v9, %v943_v41  ;;  %v799_v4 = vand.u32 31, %v797_v56 }
  0xb3   :  { %3853 = vsinq.f32 %v1555_v28  ;;  %v1650_v61 = vand.u32 2147483647, %v1649_v29  ;;  %v792_v26 = vand.u32 8388607, %v785_v53  ;;  %v4470_v22 = vand.u32 3, %v1870_v3 }
  0xb4   :  { %v949_v42 = vadd.s32 536870912, %v948_v63  ;;  %v800_v28 = vsub.s32 32, %v799_v4  ;;  %v802_v8 = vshll.u32 %v3998_v55, %v799_v4  ;;  %v798_v27 = vshrl.u32 %v797_v56, 5 }
  0xb5   :  { %v1653_v6 = vmul.f32 %v1652_v32, %v1650_v61  ;;  %v805_v31 = vshll.u32 %v4000_v59, %v799_v4  ;;  %v808_v44 = vshll.u32 %v4001_v62, %v799_v4  ;;  %v793_v46 = vor.u32 8388608, %v792_v26 }
  0xb6   :  { %v4453_v52 = vshrl.u32 %v949_v42, 30  ;;  %v803_v17 = vshrl.u32 %v4000_v59, %v800_v28  ;;  %v806_v39 = vshrl.u32 %v4001_v62, %v800_v28  ;;  %v809_v25 = vshrl.u32 %v3999_v57, %v800_v28 }
  0xb7   :  { %v1654_v14 = vxor.u32 2147483648, %v1653_v6  ;;  %v811_v49 = vshll.u32 %v3999_v57, %v799_v4  ;;  %vm1668_vm3 = vcmp.eq.s32.totalorder %v4445_v40, 2  ;;  %v801_v50 = vshrl.u32 %v3998_v55, %v800_v28 }
  0xb8   :  { %v951_v21 = vshll.u32 %v4453_v52, 30  ;;  %v804_v41 = vor.u32 %v803_v17, %v802_v8  ;;  %v812_v51 = vshrl.u32 %v4002_v2, %v800_v28  ;;  %vm1665_vm4 = vcmp.eq.s32.totalorder %v4445_v40, 0 }
  0xb9   :  { %v1655_v20 = vsel %vm1572_vm7, %v1654_v14, %v1653_v6  ;;  %v807_v45 = vor.u32 %v806_v39, %v805_v31  ;;  %v810_v29 = vor.u32 %v809_v25, %v808_v44  ;;  %v814_v32 = vshll.u32 %v4002_v2, %v799_v4 }
  0xba   :  { %v1658_v30 = vsel %vm4428_vm9, %v4250_v43, %v1655_v20  ;;  %v4473_v34 = vsub.s32 %v948_v63, %v951_v21  ;;  %v815_v48 = vshrl.u32 %v4004_v12, %v800_v28  ;;  %vm1872_vm5 = vcmp.lt.s32.totalorder %v4470_v22, 2 }
  0xbb   :  { %3855 = vcosq.f32 %v1658_v30  ;;  %vm1873_vm6 = vcmp.eq.s32.totalorder %v4470_v22, 0  ;;  %vm1664_vm7 = vcmp.lt.s32.totalorder %v4445_v40, 2  ;;  %v813_v56 = vor.u32 %v812_v51, %v811_v49 }
  0xbc   :  { %v3852_v58 = vpop.eup %3851  ;;  %3857 = vsinq.f32 %v1658_v30  ;;  %v954_v13 = vsub.s32 0, %v4473_v34  ;;  %vm1662_vm9 = vweird.f32 %v4250_v43  ;;  %v4492_v61 = vshll.u32 %v793_v46, 8  ;;  %v461_v43 = vld [vmem:[%s5034_s6 + $0x38] sm:$0xff] }
  0xbd   :  { %v3854_v0 = vpop.eup %3853  ;;  %v1566_v1 = vxor.u32 2147483648, %v3852_v58  ;;  %vm819_vm12 = vcmp.lt.s32.totalorder %v798_v27, 3  ;;  %vm820_vm13 = vcmp.lt.s32.totalorder %v798_v27, 4 }
  0xbe   :  { %v1563_v5 = vxor.u32 2147483648, %v3854_v0  ;;  %v2948_v9 = vmin.u32 %v954_v13, %v4473_v34  ;;  %v822_v3 = vsel %vm820_vm13, %v810_v29, 2102212464 }
  0xbf   :  { %v1774_v7 = vsel %vm1772_vm1, %v1566_v1, %v3854_v0  ;;  %v1567_v37 = vsel %vm1565_vm14, %v1566_v1, %v3854_v0  ;;  %vm890_vm1 = vcmp.lt.s32.totalorder %v4290_v35, 0 }
  0xc0   :  { %v1771_v33 = vsel %vm1769_vm2, %v3852_v58, %v1563_v5  ;;  %v1564_v10 = vsel %vm1562_vm11, %v3852_v58, %v1563_v5  ;;  %v816_v58 = vor.u32 %v815_v48, %v814_v32  ;;  %vm818_vm11 = vcmp.lt.s32.totalorder %v798_v27, 2 }
  0xc1   :  { %v1775_v15 = vsel %vm1768_vm15, %v1771_v33, %v1774_v7  ;;  %v1568_v16 = vsel %vm1561_vm10, %v1564_v10, %v1567_v37  ;;  %vm1876_vm10 = vcmp.eq.s32.totalorder %v4470_v22, 2  ;;  %v956_v63 = vclz %v2948_v9  ;;  %v459_v9 = vld [vmem:[%s5034_s6 + $0x28] sm:$0xff] }
  0xc2   :  { %v1776_v18 = vsel %vm1559_vm8, nan, %v1775_v15  ;;  %v1569_v19 = vsel %vm1559_vm8, nan, %v1568_v16  ;;  %vm817_vm8 = vcmp.lt.s32.totalorder %v798_v27, 1  ;;  %v826_v5 = vsel %vm820_vm13, %v813_v56, 920167782 }
  0xc3   :  { %2109 = vperm.xlu1 %3850, %v1776_v18   ;;  %2091 = vperm.xlu0 %3849, %v1569_v19   ;;  %v821_v0 = vsel %vm817_vm8, %v801_v50, %v804_v41  ;;  %v825_v4 = vsel %vm817_vm8, %v804_v41, %v807_v45  ;;  %v829_v6 = vsel %vm817_vm8, %v807_v45, %v810_v29  ;;  %v2949_v7 = vadd.s32 4294967294, %v956_v63 }
  0xc4   :  { %v823_v37 = vsel %vm819_vm12, %v807_v45, %v822_v3  ;;  %v827_v26 = vsel %vm819_vm12, %v810_v29, %v826_v5  ;;  %v830_v28 = vsel %vm820_vm13, %v816_v58, 1326507024  ;;  %v944_v33 = vadd.s32 %v4420_v24, %v4418_v23  ;;  %v456_v23 = vld [vmem:[%s5034_s6 + $0x10] sm:$0xff]  ;;  %v457_v24 = vld [vmem:[%s5034_s6 + $0x18] sm:$0xff] }
  0xc5   :  { %v824_v10 = vsel %vm818_vm11, %v821_v0, %v823_v37  ;;  %v828_v14 = vsel %vm818_vm11, %v825_v4, %v827_v26  ;;  %v831_v15 = vsel %vm819_vm12, %v813_v56, %v830_v28  ;;  %v3856_v16 = vpop.eup %3855  ;;  %vm2950_vm14 = vcmp.lt.s32.totalorder %v2949_v7, 0  ;;  %v460_v5 = vld [vmem:[%s5034_s6 + $0x30] sm:$0xff] }
  0xc6   :  { %v832_v8 = vsel %vm818_vm11, %v829_v6, %v831_v15  ;;  %v4503_v17 = vmul.u32.u64.low %v4492_v61, %v828_v14  ;;  %v4504_v18 = vmul.u32.u64.high %v4492_v61, %v828_v14, %v4503_v17  ;;  %v3858_v19 = vpop.eup %3857  ;;  %v1669_v21 = vxor.u32 2147483648, %v3856_v16  ;;  %v462_v14 = vld [vmem:[%s5034_s6 + $0x40] sm:$0xff]  ;;  %v463_v15 = vld [vmem:[%s5034_s6 + $0x48] sm:$0xff] }
  0xc7   :  { %v959_v30 = vsel %vm2950_vm14, 0, %v2949_v7  ;;  %v4514_v27 = vmul.u32.u64.low %v4492_v61, %v832_v8  ;;  %v4515_v31 = vmul.u32.u64.high %v4492_v61, %v832_v8, %v4514_v27  ;;  %v1666_v46 = vxor.u32 2147483648, %v3858_v19 }
  0xc8   :  { %v960_v25 = vsub.s32 32, %v959_v30  ;;  %v961_v49 = vshll.u32 %v4473_v34, %v959_v30  ;;  %v1878_v50 = vsel %vm1876_vm10, %v1669_v21, %v3858_v19  ;;  %v1670_v41 = vsel %vm1668_vm3, %v1669_v21, %v3858_v19  ;;  %v458_v34 = vld [vmem:[%s5034_s6 + $0x20] sm:$0xff] }
  0xc9   :  { %v964_v51 = vsub.s32 4294967266, %v959_v30  ;;  %v4524_v45 = vpack.c.bf16 %v457_v24, %v456_v23  ;;  %v1875_v29 = vsel %vm1873_vm6, %v3856_v16, %v1666_v46  ;;  %v1667_v32 = vsel %vm1665_vm4, %v3856_v16, %v1666_v46  ;;  %v464_v30 = vld [vmem:[%s5034_s6 + $0x50] sm:$0xff] }
  0xca   :  { %v962_v48 = vshrl.u32 %v944_v33, %v960_v25  ;;  %v1879_v56 = vsel %vm1872_vm5, %v1875_v29, %v1878_v50  ;;  %v1671_v58 = vsel %vm1664_vm7, %v1667_v32, %v1670_v41  ;;  %v840_v0 = vmul.u32 %v4492_v61, %v824_v10  ;;  %v467_v50 = vld [vmem:[%s5034_s6 + $0x68] sm:$0xff] }
  0xcb   :  { %v965_v63 = vadd.s32 127, %v964_v51  ;;  %v1672_v3 = vsel %vm1662_vm9, nan, %v1671_v58  ;;  %vm842_vm15 = vc.u32 %v4515_v31, %v4503_v17  ;;  %v843_v22 = vadd.s32 1, %v4504_v18 }
  0xcc   :  { %v963_v4 = vor.u32 %v962_v48, %v961_v49  ;;  %v3568_v61 = vpack.c.bf16 %v459_v9, %v458_v34  ;;  %2096 = vperm.xlu0 %3849, %v1672_v3   ;;  %v4559_v28 = vpack.c.bf16 %v461_v43, %v460_v5  ;;  %v974_v8 = vsub.s32 4, %v4453_v52  ;;  %v468_v34 = vld [vmem:[%s5034_s6 + $0x70] sm:$0xff]  ;;  %v469_v9 = vld [vmem:[%s5034_s6 + $0x78] sm:$0xff] }
  0xcd   :  { %v966_v40 = vshll.u32 %v965_v63, 23  ;;  %v844_v7 = vsel %vm842_vm15, %v843_v22, %v4504_v18  ;;  %vm4575_vm2 = vcmp.le.f32.partialorder %v888_v11, 0.7853982  ;;  %v4580_v24 = vpack.c.bf16 %v463_v15, %v462_v14  ;;  %v465_v11 = vld [vmem:[%s5034_s6 + $0x58] sm:$0xff] }
  0xce   :  { %v845_v37 = vadd.s32 %v844_v7, %v840_v0  ;;  %v4598_v49 = vpack.c.bf16 %v465_v11, %v464_v30  ;;  %v3588_v58 = vpack.c.bf16 %v469_v9, %v468_v34  ;;  %v841_v63 = vadd.s32 %v4503_v17, %v4515_v31 }
  0xcf   :  { %v967_v6 = vor.u32 4788187, %v966_v40  ;;  %vm980_vm8 = vweird.f32 %v4290_v35  ;;  %vm787_vm11 = vcmp.lt.s32.totalorder %v4340_v60, 0  ;;  %vm786_vm12 = vcmp.le.f32.partialorder %v785_v53, 0.7853982 }
  0xd0   :  { %v846_v33 = vadd.s32 536870912, %v845_v37 }
  0xd1   :  { %v968_v26 = vand.u32 2147483647, %v967_v6 }
  0xd2   :  { %v4571_v19 = vshrl.u32 %v846_v33, 30 }
  0xd4   :  { %v848_v21 = vshll.u32 %v4571_v19, 30 }
  0xd6   :  { %v849_v25 = vsub.s32 %v845_v37, %v848_v21 }
 0x130   :  { %v3182_v1 = vpop.f32.mrb[0].mxu1 }
 0x131   :  { %v196_v42 = vpop.f32.mrb[1].mxu1 }
 0x134   :  { %v3189_v20 = vpop.f32.mrb[2].mxu1 }
 0x135   :  { %v4517_v39 = vsub.f32 %v3182_v1, %v3189_v20  ;;  %v277_v44 = vpop.f32.mrb[3].mxu1  ;;  %v1880_v1 = vsel %vm1662_vm9, nan, %v1879_v56 }
 0x136   :  { %v286_v13 = vsub.f32 %v196_v42, %v277_v44  ;;  %2114 = vperm.xlu1 %3850, %v1880_v1   ;;  %v970_v42 = vcvt.s32.f32 %v963_v4  ;;  %v975_v44 = vsel %vm890_vm1, %v974_v8, %v4453_v52 }
 0x137   :  { %v977_v52 = vsel %vm4575_vm2, 0, %v975_v44 }
 0x138   :  { %3236 = vmatprep.mubr.f32.mxu0 %v286_v13  ;;  %v971_v16 = vmul.f32 %v970_v42, %v968_v26  ;;  %v1188_v41 = vadd.s32 3, %v977_v52  ;;  %v981_v32 = vand.u32 3, %v977_v52 }
 0x139   :  { %3237 = vmatmul.mubr.f32.vlgmr.msra.gmra.mrb[0].mxu0 %v4517_v39 }
 0x13a   :  { %3563 = vmatpush3.bf16.msra.mxu0 %v4227_v36  ;;  %v972_v23 = vxor.u32 2147483648, %v971_v16  ;;  %v1189_v56 = vand.u32 3, %v1188_v41  ;;  %vm983_vm3 = vcmp.eq.s32.totalorder %v981_v32, 0  ;;  %vm986_vm5 = vcmp.eq.s32.totalorder %v981_v32, 2 }
 0x13b   :  { %3565 = vmatprep.subr.bf16.mxu0 %v4524_v45  ;;  %vm982_vm9 = vcmp.lt.s32.totalorder %v981_v32, 2  ;;  %v1203_v32 = vand.u32 2139095040, %v4334_v54 }
 0x13c   :  { %v973_v27 = vsel %vm890_vm1, %v972_v23, %v971_v16  ;;  %vm1191_vm6 = vcmp.eq.s32.totalorder %v1189_v56, 0  ;;  %vm1194_vm7 = vcmp.eq.s32.totalorder %v1189_v56, 2  ;;  %vm1190_vm10 = vcmp.lt.s32.totalorder %v1189_v56, 2 }
 0x13d   :  { %v976_v46 = vsel %vm4575_vm2, %v4290_v35, %v973_v27  ;;  %v871_v23 = vsub.s32 4, %v4571_v19  ;;  %v1204_v34 = vshrl.u32 %v1203_v32, 23 }
 0x13e   :  { %3567 = vmatpush3.bf16.msra.mxu0 %v4524_v45  ;;  %3859 = vcosq.f32 %v976_v46 }
 0x13f   :  { %3569 = vmatprep.subr.bf16.mxu0 %v3568_v61  ;;  %3861 = vsinq.f32 %v976_v46  ;;  %v872_v21 = vsel %vm787_vm11, %v871_v23, %v4571_v19  ;;  %v2959_v9 = vadd.s32 4294967169, %v1204_v34 }
 0x140   :  { %v4561_v10 = vpop.f32.mrb[4].mxu1 }
 0x141   :  { %v429_v18 = vpop.f32.mrb[5].mxu1 }
 0x142   :  { %3571 = vmatpush3.bf16.msra.mxu0 %v3568_v61  ;;  %3271 = vmatprep.mubr.f32.mxu0 %v429_v18 }
 0x143   :  { %3306 = vmatprep.mubr.f32.mxu1 %v429_v18  ;;  %3573 = vmatprep.subr.bf16.mxu0 %v4559_v28 }
 0x144   :  { %3307 = vmatmul.mubr.f32.vlgmr.msra.gmra.mrb[6].mxu1 %v4561_v10 }
 0x145   :  { %3627 = vmatpush3.bf16.msra.mxu1 %v4227_v36  ;;  %3341 = vmatprep.mubr.f32.mxu1 %v286_v13  ;;  %v851_v36 = vsub.s32 0, %v849_v25  ;;  %v466_v13 = vld [vmem:[%s5034_s6 + $0x60] sm:$0xff] }
 0x146   :  { %3575 = vmatpush3.bf16.msra.mxu0 %v4559_v28  ;;  %3629 = vmatprep.subr.bf16.mxu1 %v4524_v45  ;;  %v3584_v29 = vpack.c.bf16 %v467_v50, %v466_v13 }
 0x147   :  { %3577 = vmatprep.subr.bf16.mxu0 %v4580_v24  ;;  %v2944_v51 = vmin.u32 %v851_v36, %v849_v25 }
 0x148   :  { %v3860_v0 = vpop.eup %3859 }
 0x149   :  { %3631 = vmatpush3.bf16.msra.mxu1 %v4524_v45  ;;  %v853_v48 = vclz %v2944_v51  ;;  %v3862_v3 = vpop.eup %3861  ;;  %v987_v4 = vxor.u32 2147483648, %v3860_v0 }
 0x14a   :  { %3579 = vmatpush3.bf16.msra.mxu0 %v4580_v24  ;;  %3633 = vmatprep.subr.bf16.mxu1 %v3568_v61  ;;  %v984_v17 = vxor.u32 2147483648, %v3862_v3 }
 0x14b   :  { %3581 = vmatprep.subr.bf16.mxu0 %v4598_v49  ;;  %v2945_v45 = vadd.s32 4294967294, %v853_v48  ;;  %v988_v31 = vsel %vm986_vm5, %v987_v4, %v3862_v3  ;;  %v1196_v6 = vsel %vm1194_vm7, %v987_v4, %v3862_v3 }
 0x14c   :  { %v985_v42 = vsel %vm983_vm3, %v3860_v0, %v984_v17  ;;  %v1193_v7 = vsel %vm1191_vm6, %v3860_v0, %v984_v17 }
 0x14d   :  { %3635 = vmatpush3.bf16.msra.mxu1 %v3568_v61  ;;  %vm2946_vm4 = vcmp.lt.s32.totalorder %v2945_v45, 0  ;;  %v989_v37 = vsel %vm982_vm9, %v985_v42, %v988_v31  ;;  %v1197_v33 = vsel %vm1190_vm10, %v1193_v7, %v1196_v6 }
 0x14e   :  { %3583 = vmatpush3.bf16.msra.mxu0 %v4598_v49  ;;  %3637 = vmatprep.subr.bf16.mxu1 %v4559_v28  ;;  %v856_v1 = vsel %vm2946_vm4, 0, %v2945_v45  ;;  %v990_v14 = vsel %vm980_vm8, nan, %v989_v37  ;;  %v1198_v8 = vsel %vm980_vm8, nan, %v1197_v33  ;;  %vm877_vm4 = vweird.f32 %v4340_v60 }
 0x14f   :  { %3585 = vmatprep.subr.bf16.mxu0 %v3584_v29  ;;  %v857_v40 = vsub.s32 32, %v856_v1  ;;  %v858_v22 = vshll.u32 %v849_v25, %v856_v1  ;;  %v861_v61 = vsub.s32 4294967266, %v856_v1  ;;  %1414 = vperm.xlu1 %3850, %v990_v14   ;;  %v1210_v45 = vadd.s32 1, %v2959_v9 }
 0x151   :  { %3639 = vmatpush3.bf16.msra.mxu1 %v4559_v28  ;;  %v859_v5 = vshrl.u32 %v841_v63, %v857_v40  ;;  %v862_v43 = vadd.s32 127, %v861_v61  ;;  %vm1211_vm5 = vcmp.gt.s32.totalorder %v1210_v45, 0  ;;  %v1200_v61 = vand.u32 2147483647, %v4334_v54 }
 0x152   :  { %3587 = vmatpush3.bf16.msra.mxu0 %v3584_v29  ;;  %3641 = vmatprep.subr.bf16.mxu1 %v4580_v24  ;;  %v1212_v63 = vsel %vm1211_vm5, %v1210_v45, 0 }
 0x153   :  { %3589 = vmatprep.subr.bf16.mxu0 %v3588_v58  ;;  %v860_v26 = vor.u32 %v859_v5, %v858_v22  ;;  %v863_v28 = vshll.u32 %v862_v43, 23  ;;  %1432 = vperm.xlu1 %3850, %v1198_v8   ;;  %v1214_v0 = vand.u32 31, %v1212_v63  ;;  %v4657_v22 = vshrl.u32 %v1212_v63, 5 }
 0x154   :  { %vm1201_vm5 = vcmp.le.f32.partialorder %v1200_v61, 0.7853982 }
 0x155   :  { %3643 = vmatpush3.bf16.msra.mxu1 %v4580_v24  ;;  %v864_v15 = vor.u32 4788187, %v863_v28  ;;  %v867_v16 = vcvt.s32.f32 %v860_v26  ;;  %v4650_v4 = vsub.s32 32, %v1214_v0  ;;  %v1229_v17 = vshll.u32 %v4002_v2, %v1214_v0 }
 0x156   :  { %3591 = vmatpush3.bf16.msra.mxu0 %v3588_v58  ;;  %3645 = vmatprep.subr.bf16.mxu1 %v4598_v49  ;;  %v1217_v5 = vshll.u32 %v3998_v55, %v1214_v0  ;;  %v1220_v6 = vshll.u32 %v4000_v59, %v1214_v0  ;;  %v1223_v7 = vshll.u32 %v4001_v62, %v1214_v0  ;;  %vm1235_vm7 = vcmp.lt.s32.totalorder %v4657_v22, 4 }
 0x157   :  { %v865_v18 = vand.u32 2147483647, %v864_v15  ;;  %v1227_v40 = vshrl.u32 %v4002_v2, %v4650_v4  ;;  %v1230_v31 = vshrl.u32 %v4004_v12, %v4650_v4  ;;  %v1218_v43 = vshrl.u32 %v4000_v59, %v4650_v4 }
 0x158   :  { %v1221_v42 = vshrl.u32 %v4001_v62, %v4650_v4  ;;  %v1224_v37 = vshrl.u32 %v3999_v57, %v4650_v4  ;;  %vm1232_vm8 = vcmp.lt.s32.totalorder %v4657_v22, 1  ;;  %vm1234_vm9 = vcmp.lt.s32.totalorder %v4657_v22, 3 }
 0x159   :  { %3647 = vmatpush3.bf16.msra.mxu1 %v4598_v49  ;;  %3272 = vmatmul.mubr.f32.vlgmr.msra.gmra.mrb[2].mxu0 %v4561_v10  ;;  %v868_v20 = vmul.f32 %v867_v16, %v865_v18  ;;  %v874_v10 = vsel %vm786_vm12, 0, %v872_v21  ;;  %v1207_v16 = vand.u32 8388607, %v1200_v61  ;;  %v1231_v8 = vor.u32 %v1230_v31, %v1229_v17 }
 0x15a   :  { %3649 = vmatprep.subr.bf16.mxu1 %v3584_v29  ;;  %v1084_v11 = vadd.s32 3, %v874_v10  ;;  %v878_v27 = vand.u32 3, %v874_v10  ;;  %v1219_v21 = vor.u32 %v1218_v43, %v1217_v5  ;;  %v1225_v10 = vor.u32 %v1224_v37, %v1223_v7 }
 0x15b   :  { %v869_v24 = vxor.u32 2147483648, %v868_v20  ;;  %v1216_v63 = vshrl.u32 %v3998_v55, %v4650_v4 }
 0x15c   :  { %v1085_v44 = vand.u32 3, %v1084_v11  ;;  %vm883_vm13 = vcmp.eq.s32.totalorder %v878_v27, 2  ;;  %vm880_vm15 = vcmp.eq.s32.totalorder %v878_v27, 0  ;;  %vm879_vm2 = vcmp.lt.s32.totalorder %v878_v27, 2 }
 0x15d   :  { %3651 = vmatpush3.bf16.msra.mxu1 %v3584_v29  ;;  %v870_v35 = vsel %vm787_vm11, %v869_v24, %v868_v20  ;;  %v4646_v29 = vmul.f32 %v4236_v38, %v4327_v47  ;;  %v1226_v47 = vshll.u32 %v3999_v57, %v1214_v0  ;;  %vm1233_vm11 = vcmp.lt.s32.totalorder %v4657_v22, 2 }
 0x15e   :  { %3653 = vmatprep.subr.bf16.mxu1 %v3588_v58  ;;  %v873_v30 = vsel %vm786_vm12, %v4340_v60, %v870_v35  ;;  %vm1090_vm14 = vcmp.eq.s32.totalorder %v1085_v44, 2  ;;  %vm1087_vm1 = vcmp.eq.s32.totalorder %v1085_v44, 0  ;;  %vm1086_vm3 = vcmp.lt.s32.totalorder %v1085_v44, 2 }
 0x15f   :  { %3863 = vcosq.f32 %v873_v30  ;;  %v1885_v48 = vand.u32 2139095040, %v4646_v29  ;;  %v1882_v28 = vand.u32 2147483647, %v4646_v29  ;;  %v1228_v14 = vor.u32 %v1227_v40, %v1226_v47 }
 0x160   :  { %3865 = vsinq.f32 %v873_v30  ;;  %v1222_v30 = vor.u32 %v1221_v42, %v1220_v6  ;;  %v1208_v44 = vor.u32 8388608, %v1207_v16  ;;  %v1237_v47 = vsel %vm1235_vm7, %v1225_v10, 2102212464 }
 0x161   :  { %3655 = vmatpush3.bf16.msra.mxu1 %v3588_v58  ;;  %v1886_v60 = vshrl.u32 %v1885_v48, 23  ;;  %v1241_v27 = vsel %vm1235_vm7, %v1228_v14, 920167782  ;;  %v1236_v31 = vsel %vm1232_vm8, %v1216_v63, %v1219_v21 }
 0x162   :  { %v1238_v5 = vsel %vm1234_vm9, %v1222_v30, %v1237_v47 }
 0x163   :  { %v2984_v56 = vadd.s32 4294967169, %v1886_v60 }
 0x164   :  { %3342 = vmatmul.mubr.f32.vlgmr.msra.gmra.mrb[6].mxu1 %v4517_v39 }
 0x165   :  { %v1892_v58 = vadd.s32 1, %v2984_v56 }
 0x167   :  { %vm1893_vm6 = vcmp.gt.s32.totalorder %v1892_v58, 0 }
 0x168   :  { %v1894_v1 = vsel %vm1893_vm6, %v1892_v58, 0  ;;  %vm1884_vm6 = vcmp.lt.s32.totalorder %v4646_v29, 0 }
 0x169   :  { %v3864_v46 = vpop.eup %3863  ;;  %v1896_v3 = vand.u32 31, %v1894_v1  ;;  %v4672_v26 = vshrl.u32 %v1894_v1, 5 }
 0x16a   :  { %v3866_v53 = vpop.eup %3865  ;;  %v884_v25 = vxor.u32 2147483648, %v3864_v46 }
 0x16b   :  { %v881_v19 = vxor.u32 2147483648, %v3866_v53  ;;  %v4652_v38 = vsub.s32 32, %v1896_v3  ;;  %v1908_v33 = vshll.u32 %v3999_v57, %v1896_v3  ;;  %v1899_v18 = vshll.u32 %v3998_v55, %v1896_v3 }
 0x16c   :  { %v885_v49 = vsel %vm883_vm13, %v884_v25, %v3866_v53  ;;  %v1092_v52 = vsel %vm1090_vm14, %v884_v25, %v3866_v53  ;;  %v1911_v23 = vshll.u32 %v4002_v2, %v1896_v3  ;;  %v1902_v35 = vshll.u32 %v4000_v59, %v1896_v3 }
 0x16d   :  { %v882_v36 = vsel %vm880_vm15, %v3864_v46, %v881_v19  ;;  %v1089_v13 = vsel %vm1087_vm1, %v3864_v46, %v881_v19  ;;  %v1909_v15 = vshrl.u32 %v4002_v2, %v4652_v38  ;;  %v1900_v20 = vshrl.u32 %v4000_v59, %v4652_v38 }
 0x16e   :  { %v886_v50 = vsel %vm879_vm2, %v882_v36, %v885_v49  ;;  %v1093_v39 = vsel %vm1086_vm3, %v1089_v13, %v1092_v52  ;;  %v1912_v24 = vshrl.u32 %v4004_v12, %v4652_v38  ;;  %v1903_v11 = vshrl.u32 %v4001_v62, %v4652_v38 }
 0x16f   :  { %v887_v41 = vsel %vm877_vm4, nan, %v886_v50  ;;  %v1094_v51 = vsel %vm877_vm4, nan, %v1093_v39  ;;  %v1905_v2 = vshll.u32 %v4001_v62, %v1896_v3  ;;  %v1906_v12 = vshrl.u32 %v3999_v57, %v4652_v38 }
 0x170   :  { %1409 = vperm.xlu0 %3849, %v887_v41   ;;  %v1245_v59 = vsel %vm1235_vm7, %v1231_v8, 1326507024  ;;  %v1889_v46 = vand.u32 8388607, %v1882_v28  ;;  %v1910_v53 = vor.u32 %v1909_v15, %v1908_v33  ;;  %v1913_v25 = vor.u32 %v1912_v24, %v1911_v23 }
 0x171   :  { %vm1917_vm10 = vcmp.lt.s32.totalorder %v4672_v26, 4  ;;  %v1240_v19 = vsel %vm1232_vm8, %v1219_v21, %v1222_v30  ;;  %v1242_v62 = vsel %vm1234_vm9, %v1225_v10, %v1241_v27  ;;  %v1901_v57 = vor.u32 %v1900_v20, %v1899_v18 }
 0x172   :  { %v1904_v49 = vor.u32 %v1903_v11, %v1902_v35  ;;  %v1244_v52 = vsel %vm1232_vm8, %v1222_v30, %v1225_v10  ;;  %v1246_v36 = vsel %vm1234_vm9, %v1228_v14, %v1245_v59  ;;  %v1907_v13 = vor.u32 %v1906_v12, %v1905_v2 }
 0x173   :  { %vm1914_vm12 = vcmp.lt.s32.totalorder %v4672_v26, 1  ;;  %v1248_v50 = vshll.u32 %v1208_v44, 8  ;;  %vm1916_vm13 = vcmp.lt.s32.totalorder %v4672_v26, 3  ;;  %v1923_v39 = vsel %vm1917_vm10, %v1910_v53, 920167782 }
 0x174   :  { %1427 = vperm.xlu0 %3849, %v1094_v51   ;;  %v1243_v41 = vsel %vm1233_vm11, %v1240_v19, %v1242_v62  ;;  %v1890_v51 = vor.u32 8388608, %v1889_v46  ;;  %v1927_v32 = vsel %vm1917_vm10, %v1913_v25, 1326507024  ;;  %v1247_v48 = vsel %vm1233_vm11, %v1244_v52, %v1246_v36 }
 0x175   :  { %vm1915_vm14 = vcmp.lt.s32.totalorder %v4672_v26, 2  ;;  %v1922_v34 = vsel %vm1914_vm12, %v1901_v57, %v1904_v49  ;;  %v1924_v60 = vsel %vm1916_vm13, %v1907_v13, %v1923_v39  ;;  %v1926_v9 = vsel %vm1914_vm12, %v1904_v49, %v1907_v13 }
 0x176   :  { %v4728_v56 = vmul.u32.u64.low %v1248_v50, %v1243_v41  ;;  %v4729_v45 = vmul.u32.u64.high %v1248_v50, %v1243_v41, %v4728_v56  ;;  %v1928_v58 = vsel %vm1916_vm13, %v1910_v53, %v1927_v32  ;;  %v1930_v3 = vshll.u32 %v1890_v51, 8 }
 0x177   :  { %v4735_v0 = vmul.u32.u64.low %v1248_v50, %v1247_v48  ;;  %v4736_v1 = vmul.u32.u64.high %v1248_v50, %v1247_v48, %v4735_v0  ;;  %v1925_v40 = vsel %vm1915_vm14, %v1922_v34, %v1924_v60  ;;  %v1929_v17 = vsel %vm1915_vm14, %v1926_v9, %v1928_v58 }
 0x178   :  { %v4748_v4 = vmul.u32.u64.low %v1930_v3, %v1925_v40  ;;  %v4749_v43 = vmul.u32.u64.high %v1930_v3, %v1925_v40, %v4748_v4  ;;  %v1898_v6 = vshrl.u32 %v3998_v55, %v4652_v38  ;;  %v1919_v37 = vsel %vm1917_vm10, %v1907_v13, 2102212464 }
 0x179   :  { %v4753_v42 = vmul.u32.u64.low %v1930_v3, %v1929_v17  ;;  %v4754_v7 = vmul.u32.u64.high %v1930_v3, %v1929_v17, %v4753_v42  ;;  %v1239_v33 = vsel %vm1233_vm11, %v1236_v31, %v1238_v5  ;;  %v1258_v14 = vadd.s32 1, %v4729_v45 }
 0x17a   :  { %vm1257_vm15 = vc.u32 %v4736_v1, %v4728_v56  ;;  %v1918_v15 = vsel %vm1914_vm12, %v1898_v6, %v1901_v57  ;;  %v1920_v16 = vsel %vm1916_vm13, %v1904_v49, %v1919_v37  ;;  %v1255_v55 = vmul.u32 %v1248_v50, %v1239_v33 }
 0x17b   :  { %v1259_v38 = vsel %vm1257_vm15, %v1258_v14, %v4729_v45  ;;  %v1921_v8 = vsel %vm1915_vm14, %v1918_v15, %v1920_v16  ;;  %v1940_v18 = vadd.s32 1, %v4749_v43  ;;  %vm1939_vm1 = vc.u32 %v4754_v7, %v4748_v4 }
 0x17c   :  { %v1260_v22 = vadd.s32 %v1259_v38, %v1255_v55  ;;  %v1937_v20 = vmul.u32 %v1930_v3, %v1921_v8  ;;  %v1256_v36 = vadd.s32 %v4728_v56, %v4736_v1  ;;  %v1938_v48 = vadd.s32 %v4748_v4, %v4754_v7 }
 0x17d   :  { %v1941_v23 = vsel %vm1939_vm1, %v1940_v18, %v4749_v43  ;;  %vm1202_vm4 = vcmp.lt.s32.totalorder %v4334_v54, 0  ;;  %vm1883_vm7 = vcmp.le.f32.partialorder %v1882_v28, 0.7853982  ;;  %vm1292_vm1 = vweird.f32 %v4334_v54 }
 0x17e   :  { %v1261_v24 = vadd.s32 536870912, %v1260_v22  ;;  %v1942_v35 = vadd.s32 %v1941_v23, %v1937_v20  ;;  %v4786_v20 = vpop.permute.xlu1 %2109  ;;  %v4788_v23 = vpop.permute.xlu0 %2091 }
 0x180   :  { %v1262_v21 = vshrl.u32 %v1261_v24, 30  ;;  %v1943_v30 = vadd.s32 536870912, %v1942_v35 }
 0x182   :  { %v1263_v10 = vshll.u32 %v1262_v21, 30  ;;  %v1944_v11 = vshrl.u32 %v1943_v30, 30  ;;  %v1286_v42 = vsub.s32 4, %v1262_v21  ;;  %v1418_v30 = vlaneseq }
 0x184   :  { %v1264_v27 = vsub.s32 %v1260_v22, %v1263_v10  ;;  %v1945_v2 = vshll.u32 %v1944_v11, 30  ;;  %v1287_v33 = vsel %vm1202_vm4, %v1286_v42, %v1262_v21  ;;  %v1968_v15 = vsub.s32 4, %v1944_v11 }
 0x185   :  { %v1289_v55 = vsel %vm1201_vm5, 0, %v1287_v33 }
 0x186   :  { %v1266_v12 = vsub.s32 0, %v1264_v27  ;;  %v1946_v44 = vsub.s32 %v1942_v35, %v1945_v2  ;;  %v1969_v38 = vsel %vm1884_vm6, %v1968_v15, %v1944_v11  ;;  %v1396_v8 = vadd.s32 3, %v1289_v55 }
 0x187   :  { %v1971_v18 = vsel %vm1883_vm7, 0, %v1969_v38  ;;  %v1293_v24 = vand.u32 3, %v1289_v55  ;;  %v772_v55 = vld [vmem:[%s5039_s11] sm:$0xff] }
 0x188   :  { %v2960_v26 = vmin.u32 %v1266_v12, %v1264_v27  ;;  %v1948_v59 = vsub.s32 0, %v1946_v44  ;;  %v1397_v35 = vand.u32 3, %v1396_v8  ;;  %v2078_v21 = vadd.s32 3, %v1971_v18 }
 0x189   :  { %vm1295_vm8 = vcmp.eq.s32.totalorder %v1293_v24, 0  ;;  %vm1298_vm9 = vcmp.eq.s32.totalorder %v1293_v24, 2  ;;  %v1975_v2 = vand.u32 3, %v1971_v18  ;;  %vm1294_vm12 = vcmp.lt.s32.totalorder %v1293_v24, 2 }
 0x18a   :  { %v1268_v46 = vclz %v2960_v26  ;;  %v2985_v53 = vmin.u32 %v1948_v59, %v1946_v44  ;;  %vm1399_vm10 = vcmp.eq.s32.totalorder %v1397_v35, 0  ;;  %vm1402_vm11 = vcmp.eq.s32.totalorder %v1397_v35, 2 }
 0x18b   :  { %v2079_v12 = vand.u32 3, %v2078_v21  ;;  %v1419_v59 = vshrl.u32 %v1418_v30, 7  ;;  %vm1398_vm13 = vcmp.lt.s32.totalorder %v1397_v35, 2  ;;  %vm1980_vm14 = vcmp.eq.s32.totalorder %v1975_v2, 2 }
 0x18c   :  { %v2961_v25 = vadd.s32 4294967294, %v1268_v46  ;;  %v1950_v19 = vclz %v2985_v53  ;;  %v4792_v46 = vpop.permute.xlu0 %2096 }
 0x18d   :  { %vm2084_vm15 = vcmp.eq.s32.totalorder %v2079_v12, 2 }
 0x18e   :  { %vm2962_vm2 = vcmp.lt.s32.totalorder %v2961_v25, 0  ;;  %v2986_v62 = vadd.s32 4294967294, %v1950_v19 }
 0x18f   :  { %v1271_v57 = vsel %vm2962_vm2, 0, %v2961_v25  ;;  %vm1977_vm2 = vcmp.eq.s32.totalorder %v1975_v2, 0 }
 0x190   :  { %vm2987_vm3 = vcmp.lt.s32.totalorder %v2986_v62, 0  ;;  %v1276_v49 = vsub.s32 4294967266, %v1271_v57  ;;  %v1272_v13 = vsub.s32 32, %v1271_v57  ;;  %v1273_v41 = vshll.u32 %v1264_v27, %v1271_v57 }
 0x191   :  { %v1953_v52 = vsel %vm2987_vm3, 0, %v2986_v62  ;;  %vm2081_vm3 = vcmp.eq.s32.totalorder %v2079_v12, 0 }
 0x192   :  { %v1277_v50 = vadd.s32 127, %v1276_v49  ;;  %v1958_v39 = vsub.s32 4294967266, %v1953_v52  ;;  %v1274_v51 = vshrl.u32 %v1256_v36, %v1272_v13  ;;  %v1954_v34 = vsub.s32 32, %v1953_v52 }
 0x193   :  { %v1955_v58 = vshll.u32 %v1946_v44, %v1953_v52  ;;  %v1420_v13 = vsub.s32 0, %v1419_v59 }
 0x194   :  { %v1278_v32 = vshll.u32 %v1277_v50, 23  ;;  %v1959_v60 = vadd.s32 127, %v1958_v39  ;;  %v1275_v9 = vor.u32 %v1274_v51, %v1273_v41  ;;  %v1956_v63 = vshrl.u32 %v1938_v48, %v1954_v34 }
 0x196   :  { %v1279_v45 = vor.u32 4788187, %v1278_v32  ;;  %v1960_v0 = vshll.u32 %v1959_v60, 23  ;;  %v1282_v47 = vcvt.s32.f32 %v1275_v9  ;;  %v1957_v40 = vor.u32 %v1956_v63, %v1955_v58 }
 0x198   :  { %v1280_v3 = vand.u32 2147483647, %v1279_v45  ;;  %v1961_v17 = vor.u32 4788187, %v1960_v0  ;;  %v1964_v31 = vcvt.s32.f32 %v1957_v40 }
 0x19a   :  { %v1283_v56 = vmul.f32 %v1282_v47, %v1280_v3  ;;  %v1962_v1 = vand.u32 2147483647, %v1961_v17 }
 0x19c   :  { %v1284_v5 = vxor.u32 2147483648, %v1283_v56  ;;  %v1965_v43 = vmul.f32 %v1964_v31, %v1962_v1 }
 0x19e   :  { %v1285_v4 = vsel %vm1202_vm4, %v1284_v5, %v1283_v56  ;;  %v1966_v6 = vxor.u32 2147483648, %v1965_v43  ;;  %vm1976_vm4 = vcmp.lt.s32.totalorder %v1975_v2, 2 }
 0x19f   :  { %v1288_v7 = vsel %vm1201_vm5, %v4334_v54, %v1285_v4  ;;  %vm2080_vm5 = vcmp.lt.s32.totalorder %v2079_v12, 2 }
 0x1a0   :  { %v1967_v37 = vsel %vm1884_vm6, %v1966_v6, %v1965_v43  ;;  %3867 = vcosq.f32 %v1288_v7  ;;  %vm1974_vm6 = vweird.f32 %v4646_v29 }
 0x1a1   :  { %3869 = vsinq.f32 %v1288_v7  ;;  %v1970_v61 = vsel %vm1883_vm7, %v4646_v29, %v1967_v37  ;;  %v773_v29 = vld [vmem:[%s5039_s11 + $0x8] sm:$0xff]  ;;  %s4005_s11 = smov 48  }
 0x1a2   :  { %3871 = vcosq.f32 %v1970_v61 }
 0x1a3   :  { %3873 = vsinq.f32 %v1970_v61 }
 0x1aa   :  { %v3868_v22 = vpop.eup %3867 }
 0x1ab   :  { %v3870_v28 = vpop.eup %3869  ;;  %v1299_v27 = vxor.u32 2147483648, %v3868_v22 }
 0x1ac   :  { %v1296_v10 = vxor.u32 2147483648, %v3870_v28  ;;  %v3872_v11 = vpop.eup %3871 }
 0x1ad   :  { %v3874_v26 = vpop.eup %3873  ;;  %v1300_v25 = vsel %vm1298_vm9, %v1299_v27, %v3870_v28  ;;  %v1404_v62 = vsel %vm1402_vm11, %v1299_v27, %v3870_v28  ;;  %v1981_v57 = vxor.u32 2147483648, %v3872_v11 }
 0x1ae   :  { %v1297_v53 = vsel %vm1295_vm8, %v3868_v22, %v1296_v10  ;;  %v1401_v19 = vsel %vm1399_vm10, %v3868_v22, %v1296_v10  ;;  %v1978_v49 = vxor.u32 2147483648, %v3874_v26 }
 0x1af   :  { %v1301_v52 = vsel %vm1294_vm12, %v1297_v53, %v1300_v25  ;;  %v1405_v36 = vsel %vm1398_vm13, %v1401_v19, %v1404_v62  ;;  %v1982_v39 = vsel %vm1980_vm14, %v1981_v57, %v3874_v26  ;;  %v2086_v41 = vsel %vm2084_vm15, %v1981_v57, %v3874_v26 }
 0x1b0   :  { %v1979_v32 = vsel %vm1977_vm2, %v3872_v11, %v1978_v49  ;;  %v2083_v48 = vsel %vm2081_vm3, %v3872_v11, %v1978_v49  ;;  %v1302_v34 = vsel %vm1292_vm1, nan, %v1301_v52  ;;  %v1406_v60 = vsel %vm1292_vm1, nan, %v1405_v36  ;;  %v4816_v49 = vld [vmem:[#allocation8] sm:$0xff] }
 0x1b1   :  { %v1983_v9 = vsel %vm1976_vm4, %v1979_v32, %v1982_v39  ;;  %v2087_v45 = vsel %vm2080_vm5, %v2083_v48, %v2086_v41  ;;  %v1421_v54 = vrot.slane %v1302_v34, %v1420_v13  ;;  %v1439_v58 = vrot.slane %v1406_v60, %v1420_v13  ;;  %3348 = vmatprep.mubr.msk.f32.mxu0 %vm123_vm0, %v4816_v49 }
 0x1b2   :  { %v1984_v3 = vsel %vm1974_vm6, nan, %v1983_v9  ;;  %v2088_v47 = vsel %vm1974_vm6, nan, %v2087_v45 }
 0x1b3   :  { %v2103_v6 = vrot.slane %v1984_v3, %v1420_v13  ;;  %v2121_v42 = vrot.slane %v2088_v47, %v1420_v13  ;;  %v2475_v47 = vld [vmem:[%s5037_s9] sm:$0xff] }
 0x1b5   :  { %v4790_v44 = vpop.permute.xlu1 %2114  ;;  %v2123_v22 = vmul.f32 %v2121_v42, %v4786_v20  ;;  %v2129_v28 = vmul.f32 %v4786_v20, %v2103_v6  ;;  %v2105_v24 = vmul.f32 %v2103_v6, %v4788_v23  ;;  %v2127_v21 = vmul.f32 %v2121_v42, %v4788_v23 }
 0x1b6   :  { %v2106_v30 = vmul.f32 %v2103_v6, %v4792_v46  ;;  %v2130_v27 = vmul.f32 %v4790_v44, %v2103_v6  ;;  %v2128_v11 = vmul.f32 %v2121_v42, %v4792_v46  ;;  %v2481_v6 = vld [vmem:[%s5037_s9 + $0x30] sm:$0xff] }
 0x1b7   :  { %v2125_v59 = vsub.f32 %v2105_v24, %v2123_v22  ;;  %v2131_v53 = vadd.f32 %v2129_v28, %v2127_v21 }
 0x1b8   :  { %v2132_v25 = vadd.f32 %v2130_v27, %v2128_v11  ;;  %v2159_v27 = vld [vmem:[#allocation9] sm:$0xff]  ;;  %v2160_v11 = vld [vmem:[#allocation9 + $0x8] sm:$0xff] }
 0x1ce   :  { %v1415_v50 = vpop.permute.xlu1 %1414 }
 0x1cf   :  { %v1424_v40 = vmul.f32 %v1421_v54, %v1415_v50  ;;  %v1446_v17 = vmul.f32 %v1439_v58, %v1415_v50 }
 0x1d2   :  { %v1433_v63 = vpop.permute.xlu1 %1432 }
 0x1d3   :  { %v1442_v56 = vmul.f32 %v1439_v58, %v1433_v63  ;;  %v1448_v1 = vmul.f32 %v1433_v63, %v1421_v54 }
 0x1d5   :  { %v1444_v37 = vsub.f32 %v1424_v40, %v1442_v56  ;;  %v1450_v33 = vadd.f32 %v1448_v1, %v1446_v17  ;;  %v2476_v40 = vld [vmem:[%s5037_s9 + $0x8] sm:$0xff]  ;;  %v2477_v56 = vld [vmem:[%s5037_s9 + $0x10] sm:$0xff]  ;;  %v2478_v1 = vld [vmem:[%s5037_s9 + $0x18] sm:$0xff] }
 0x1d6   :  { %v3672_v17 = vpack.c.bf16 %v2476_v40, %v2475_v47  ;;  %v2504_v47 = vld [vmem:[%s5038_s10 + $0x68] sm:$0xff] }
 0x1d8   :  { %3737 = vmatprep.subr.bf16.mxu1 %v3672_v17 }
 0x1d9   :  { %3739 = vmatpush3.bf16.msra.mxu1 %v3672_v17 }
 0x1ef   :  { %v1410_v51 = vpop.permute.xlu0 %1409 }
 0x1f0   :  { %v1423_v31 = vmul.f32 %v1421_v54, %v1410_v51  ;;  %v1445_v5 = vmul.f32 %v1439_v58, %v1410_v51 }
 0x1f3   :  { %v1428_v0 = vpop.permute.xlu0 %1427 }
 0x1f4   :  { %v1441_v43 = vmul.f32 %v1439_v58, %v1428_v0  ;;  %v1447_v4 = vmul.f32 %v1428_v0, %v1421_v54 }
 0x1f6   :  { %v1443_v38 = vsub.f32 %v1423_v31, %v1441_v43  ;;  %v1449_v8 = vadd.f32 %v1447_v4, %v1445_v5  ;;  %v3676_v31 = vpack.c.bf16 %v2478_v1, %v2477_v56  ;;  %v2479_v5 = vld [vmem:[%s5037_s9 + $0x20] sm:$0xff]  ;;  %v2480_v43 = vld [vmem:[%s5037_s9 + $0x28] sm:$0xff]  ;;  %v2506_v56 = vld [vmem:[%s5038_s10 + $0x78] sm:$0xff] }
 0x1f7   :  { %v3680_v4 = vpack.c.bf16 %v2480_v43, %v2479_v5 }
 0x1f8   :  { %3741 = vmatprep.subr.bf16.mxu1 %v3676_v31 }
 0x1f9   :  { %3743 = vmatpush3.bf16.msra.mxu1 %v3676_v31 }
 0x1fa   :  { %3745 = vmatprep.subr.bf16.mxu1 %v3680_v4 }
 0x1fd   :  { %3747 = vmatpush3.bf16.msra.mxu1 %v3680_v4 }
 0x20c   :  { %v4781_v14 = vpop.f32.mrb[0].mxu0 }
 0x20d   :  { %v4783_v16 = vpop.f32.mrb[1].mxu0 }
 0x22c   :  { %v3273_v7 = vpop.f32.mrb[2].mxu0 }
 0x22d   :  { %v621_v15 = vsub.f32 %v4781_v14, %v3273_v7  ;;  %v611_v61 = vpop.f32.mrb[3].mxu0  ;;  %v2124_v14 = vmul.f32 %v2121_v42, %v4790_v44  ;;  %v2482_v42 = vld [vmem:[%s5037_s9 + $0x38] sm:$0xff] }
 0x22e   :  { %v620_v18 = vsub.f32 %v4783_v16, %v611_v61  ;;  %v3684_v7 = vpack.c.bf16 %v2482_v42, %v2481_v6  ;;  %v2486_v61 = vld [vmem:[%s5037_s9 + $0x58] sm:$0xff] }
 0x22f   :  { %v775_v35 = vmul.f32 %v773_v29, %v621_v15  ;;  %v2126_v26 = vsub.f32 %v2106_v30, %v2124_v14  ;;  %v2485_v15 = vld [vmem:[%s5037_s9 + $0x50] sm:$0xff]  ;;  %v2158_v30 = vld [vmem:[#allocation8 + $0x8] sm:$0xff] }
 0x230   :  { %v774_v10 = vmul.f32 %v772_v55, %v620_v18  ;;  %3749 = vmatprep.subr.bf16.mxu1 %v3684_v7 }
 0x231   :  { %v4812_v2 = vmul.f32 %v1444_v37, %v775_v35  ;;  %v1458_v16 = vmul.f32 %v1450_v33, %v775_v35  ;;  %v2134_v57 = vmul.f32 %v2126_v26, %v775_v35  ;;  %v2140_v36 = vmul.f32 %v2132_v25, %v775_v35  ;;  %3751 = vmatpush3.bf16.msra.mxu1 %v3684_v7 }
 0x232   :  { %v4814_v12 = vmul.f32 %v1443_v38, %v774_v10  ;;  %v1457_v20 = vmul.f32 %v1449_v8, %v774_v10  ;;  %v2133_v44 = vmul.f32 %v2125_v59, %v774_v10  ;;  %v2139_v46 = vmul.f32 %v2131_v53, %v774_v10 }
 0x237   :  { %v3343_v23 = vpop.f32.mrb[6].mxu1 }
 0x238   :  { %v777_v19 = vmul.f32 %v3343_v23, %v773_v29  ;;  %v763_v62 = vpop.f32.mrb[7].mxu1  ;;  %v2483_v29 = vld [vmem:[%s5037_s9 + $0x40] sm:$0xff] }
 0x239   :  { %v776_v52 = vmul.f32 %v772_v55, %v763_v62  ;;  %v3692_v55 = vpack.c.bf16 %v2486_v61, %v2485_v15 }
 0x23a   :  { %v2136_v13 = vmul.f32 %v2132_v25, %v777_v19  ;;  %v2142_v50 = vmul.f32 %v2126_v26, %v777_v19  ;;  %v1454_v39 = vmul.f32 %v1450_v33, %v777_v19  ;;  %v1460_v41 = vmul.f32 %v1444_v37, %v777_v19  ;;  %v2484_v37 = vld [vmem:[%s5037_s9 + $0x48] sm:$0xff]  ;;  %v2490_v26 = vld [vmem:[%s5037_s9 + $0x78] sm:$0xff] }
 0x23b   :  { %v2135_v51 = vmul.f32 %v2131_v53, %v776_v52  ;;  %v2141_v32 = vmul.f32 %v2125_v59, %v776_v52  ;;  %v1453_v48 = vmul.f32 %v1449_v8, %v776_v52  ;;  %v1459_v34 = vmul.f32 %v1443_v38, %v776_v52  ;;  %v2491_v53 = vld [vmem:[%s5038_s10] sm:$0xff]  ;;  %v2492_v25 = vld [vmem:[%s5038_s10 + $0x8] sm:$0xff]  ;;  %v2494_v52 = vld [vmem:[%s5038_s10 + $0x18] sm:$0xff] }
 0x23c   :  { %v2138_v60 = vsub.f32 %v2134_v57, %v2136_v13  ;;  %v2144_v9 = vadd.f32 %v2142_v50, %v2140_v36  ;;  %v1456_v45 = vsub.f32 %v4812_v2, %v1454_v39  ;;  %v1462_v54 = vadd.f32 %v1460_v41, %v1458_v16  ;;  %v2487_v2 = vld [vmem:[%s5037_s9 + $0x60] sm:$0xff]  ;;  %v2488_v16 = vld [vmem:[%s5037_s9 + $0x68] sm:$0xff] }
 0x23d   :  { %v2137_v58 = vsub.f32 %v2133_v44, %v2135_v51  ;;  %v2143_v63 = vadd.f32 %v2141_v32, %v2139_v46  ;;  %v1455_v0 = vsub.f32 %v4814_v12, %v1453_v48  ;;  %v1461_v3 = vadd.f32 %v1459_v34, %v1457_v20  ;;  %v2489_v20 = vld [vmem:[%s5037_s9 + $0x70] sm:$0xff]  ;;  %v2495_v50 = vld [vmem:[%s5038_s10 + $0x20] sm:$0xff]  ;;  %v2496_v39 = vld [vmem:[%s5038_s10 + $0x28] sm:$0xff] }
 0x23e   :  { %2147 = vrot.lane.b32.xlu1 %v2138_v60, %s4005_s11  ;;  %v3688_v33 = vpack.c.bf16 %v2484_v37, %v2483_v29  ;;  %v3696_v12 = vpack.c.bf16 %v2488_v16, %v2487_v2  ;;  %v3700_v59 = vpack.c.bf16 %v2490_v26, %v2489_v20  ;;  %v3704_v23 = vpack.c.bf16 %v2492_v25, %v2491_v53  ;;  %v2497_v51 = vld [vmem:[%s5038_s10 + $0x30] sm:$0xff]  ;;  %v2498_v32 = vld [vmem:[%s5038_s10 + $0x38] sm:$0xff]  ;;  %v2499_v60 = vld [vmem:[%s5038_s10 + $0x40] sm:$0xff] }
 0x23f   :  { %2145 = vrot.lane.b32.xlu0 %v2137_v58, %s4005_s11  ;;  %v3712_v41 = vpack.c.bf16 %v2496_v39, %v2495_v50  ;;  %v3716_v48 = vpack.c.bf16 %v2498_v32, %v2497_v51  ;;  %v2501_v58 = vld [vmem:[%s5038_s10 + $0x50] sm:$0xff] }
 0x240   :  { %3753 = vmatprep.subr.bf16.mxu1 %v3688_v33 }
 0x241   :  { %3755 = vmatpush3.bf16.msra.mxu1 %v3688_v33 }
 0x242   :  { %2153 = vrot.lane.b32.xlu1 %v2144_v9, %s4005_s11  ;;  %3757 = vmatprep.subr.bf16.mxu1 %v3692_v55  ;;  %v2500_v9 = vld [vmem:[%s5038_s10 + $0x48] sm:$0xff] }
 0x243   :  { %2151 = vrot.lane.b32.xlu0 %v2143_v63, %s4005_s11  ;;  %v2502_v63 = vld [vmem:[%s5038_s10 + $0x58] sm:$0xff] }
 0x245   :  { %3759 = vmatpush3.bf16.msra.mxu1 %v3692_v55 }
 0x246   :  { %3761 = vmatprep.subr.bf16.mxu1 %v3696_v12 }
 0x249   :  { %3763 = vmatpush3.bf16.msra.mxu1 %v3696_v12 }
 0x24a   :  { %3765 = vmatprep.subr.bf16.mxu1 %v3700_v59 }
 0x24d   :  { %3767 = vmatpush3.bf16.msra.mxu1 %v3700_v59 }
 0x24e   :  { %3769 = vmatprep.subr.bf16.mxu1 %v3704_v23 }
 0x2b0   :  { %v2148_v38 = vpop.permute.xlu1 %2147 }
 0x2b1   :  { %v2150_v8 = vadd.f32 %v2148_v38, %v1456_v45  ;;  %v2146_v18 = vpop.permute.xlu0 %2145 }
 0x2b2   :  { %v2149_v22 = vadd.f32 %v2146_v18, %v1455_v0  ;;  %v3724_v0 = vpack.c.bf16 %v2502_v63, %v2501_v58 }
 0x2b4   :  { %v3656_v28 = vpack.c.bf16 %v2150_v8, %v2149_v22  ;;  %v2154_v24 = vpop.permute.xlu1 %2153 }
 0x2b5   :  { %v2156_v35 = vadd.f32 %v2154_v24, %v1462_v54  ;;  %v2152_v21 = vpop.permute.xlu0 %2151  ;;  %v3720_v54 = vpack.c.bf16 %v2500_v9, %v2499_v60 }
 0x2b6   :  { %v2155_v14 = vadd.f32 %v2152_v21, %v1461_v3  ;;  %3657 = vmatprep.subr.bf16.mxu0 %v3656_v28  ;;  %v2503_v3 = vld [vmem:[%s5038_s10 + $0x60] sm:$0xff] }
 0x2b7   :  { %3659 = vmatpush3.bf16.msra.mxu0 %v3656_v28  ;;  %v3728_v40 = vpack.c.bf16 %v2504_v47, %v2503_v3 }
 0x2b8   :  { %v3660_v10 = vpack.c.bf16 %v2156_v35, %v2155_v14 }
 0x2ba   :  { %3349 = vmatmul.mubr.msk.f32.vlgmr.msra.gmra.mrb[4].mxu0 %vm123_vm0, %v2158_v30  ;;  %3661 = vmatprep.subr.bf16.mxu0 %v3660_v10 }
 0x2bb   :  { %3663 = vmatpush3.bf16.msra.mxu0 %v3660_v10  ;;  %3355 = vmatprep.mubr.msk.f32.mxu0 %vm123_vm0, %v2159_v27 }
 0x2bc   :  { %3665 = vmatprep.subr.bf16.mxu0 %v3656_v28 }
 0x2be   :  { %3356 = vmatmul.mubr.msk.f32.vlgmr.msra.gmra.mrb[6].mxu0 %vm123_vm0, %v2160_v11 }
 0x2bf   :  { %3667 = vmatpush3.bf16.msra.mxu0 %v3656_v28  ;;  %3362 = vmatprep.mubr.msk.f32.mxu0 %vm123_vm0, %v2159_v27 }
 0x2c0   :  { %3669 = vmatprep.subr.bf16.mxu0 %v3660_v10 }
 0x2c2   :  { %3363 = vmatmul.mubr.msk.f32.vlgmr.msra.gmra.mrb[8].mxu0 %vm123_vm0, %v2160_v11 }
 0x2c3   :  { %3671 = vmatpush3.bf16.msra.mxu0 %v3660_v10  ;;  %3369 = vmatprep.mubr.msk.f32.mxu0 %vm123_vm0, %v4816_v49  ;;  %v2493_v49 = vld [vmem:[%s5038_s10 + $0x10] sm:$0xff] }
 0x2c4   :  { %3673 = vmatprep.subr.bf16.mxu0 %v3672_v17  ;;  %v3708_v13 = vpack.c.bf16 %v2494_v52, %v2493_v49 }
 0x2ca   :  { %3370 = vmatmul.mubr.msk.f32.vlgmr.msra.gmra.mrb[8].mxu0 %vm123_vm0, %v2158_v30 }
 0x2cb   :  { %3675 = vmatpush3.bf16.msra.mxu0 %v3672_v17  ;;  %v2505_v17 = vld [vmem:[%s5038_s10 + $0x70] sm:$0xff] }
 0x2cc   :  { %3677 = vmatprep.subr.bf16.mxu0 %v3676_v31  ;;  %v3732_v1 = vpack.c.bf16 %v2506_v56, %v2505_v17 }
 0x2cf   :  { %3679 = vmatpush3.bf16.msra.mxu0 %v3676_v31 }
 0x2d0   :  { %3681 = vmatprep.subr.bf16.mxu0 %v3680_v4 }
 0x2d3   :  { %3683 = vmatpush3.bf16.msra.mxu0 %v3680_v4 }
 0x2d4   :  { %3685 = vmatprep.subr.bf16.mxu0 %v3684_v7 }
 0x2d7   :  { %3687 = vmatpush3.bf16.msra.mxu0 %v3684_v7 }
 0x2d8   :  { %3689 = vmatprep.subr.bf16.mxu0 %v3688_v33 }
 0x2db   :  { %3691 = vmatpush3.bf16.msra.mxu0 %v3688_v33 }
 0x2dc   :  { %3693 = vmatprep.subr.bf16.mxu0 %v3692_v55 }
 0x2df   :  { %3695 = vmatpush3.bf16.msra.mxu0 %v3692_v55 }
 0x2e0   :  { %3697 = vmatprep.subr.bf16.mxu0 %v3696_v12 }
 0x2e3   :  { %3699 = vmatpush3.bf16.msra.mxu0 %v3696_v12 }
 0x2e4   :  { %3701 = vmatprep.subr.bf16.mxu0 %v3700_v59 }
 0x2e7   :  { %3703 = vmatpush3.bf16.msra.mxu0 %v3700_v59 }
 0x2e8   :  { %3705 = vmatprep.subr.bf16.mxu0 %v3704_v23 }
 0x38d   :  { %v3350_v19 = vpop.f32.mrb[4].mxu0 }
 0x38e   :  { %v2233_v62 = vpop.f32.mrb[5].mxu0 }
 0x391   :  { %v3357_v57 = vpop.f32.mrb[6].mxu0 }
 0x392   :  { %v2324_v44 = vsub.f32 %v3350_v19, %v3357_v57  ;;  %v2314_v36 = vpop.f32.mrb[7].mxu0 }
 0x393   :  { %v2323_v46 = vsub.f32 %v2233_v62, %v2314_v36 }
 0x395   :  { %3404 = vmatprep.mubr.f32.mxu0 %v2323_v46 }
 0x396   :  { %3405 = vmatmul.mubr.f32.vlgmr.msra.gmra.mrb[10].mxu0 %v2324_v44 }
 0x397   :  { %3707 = vmatpush3.bf16.msra.mxu0 %v3704_v23 }
 0x398   :  { %3709 = vmatprep.subr.bf16.mxu0 %v3708_v13 }
 0x39b   :  { %3711 = vmatpush3.bf16.msra.mxu0 %v3708_v13 }
 0x39c   :  { %3713 = vmatprep.subr.bf16.mxu0 %v3712_v41 }
 0x39d   :  { %v3371_v34 = vpop.f32.mrb[8].mxu0 }
 0x39e   :  { %v2466_v45 = vpop.f32.mrb[9].mxu0 }
 0x39f   :  { %3715 = vmatpush3.bf16.msra.mxu0 %v3712_v41  ;;  %3439 = vmatprep.mubr.f32.mxu0 %v2466_v45 }
 0x3a0   :  { %3474 = vmatprep.mubr.f32.mxu1 %v2466_v45  ;;  %3717 = vmatprep.subr.bf16.mxu0 %v3716_v48 }
 0x3a1   :  { %3475 = vmatmul.mubr.f32.vlgmr.msra.gmra.mrb[8].mxu1 %v3371_v34 }
 0x3a2   :  { %3771 = vmatpush3.bf16.msra.mxu1 %v3704_v23  ;;  %3509 = vmatprep.mubr.f32.mxu1 %v2323_v46 }
 0x3a3   :  { %3719 = vmatpush3.bf16.msra.mxu0 %v3716_v48  ;;  %3773 = vmatprep.subr.bf16.mxu1 %v3708_v13 }
 0x3a4   :  { %3721 = vmatprep.subr.bf16.mxu0 %v3720_v54 }
 0x3a6   :  { %3775 = vmatpush3.bf16.msra.mxu1 %v3708_v13 }
 0x3a7   :  { %3723 = vmatpush3.bf16.msra.mxu0 %v3720_v54  ;;  %3777 = vmatprep.subr.bf16.mxu1 %v3712_v41 }
 0x3a8   :  { %3725 = vmatprep.subr.bf16.mxu0 %v3724_v0 }
 0x3aa   :  { %3779 = vmatpush3.bf16.msra.mxu1 %v3712_v41 }
 0x3ab   :  { %3727 = vmatpush3.bf16.msra.mxu0 %v3724_v0  ;;  %3781 = vmatprep.subr.bf16.mxu1 %v3716_v48 }
 0x3ac   :  { %3729 = vmatprep.subr.bf16.mxu0 %v3728_v40 }
 0x3ae   :  { %3783 = vmatpush3.bf16.msra.mxu1 %v3716_v48 }
 0x3af   :  { %3731 = vmatpush3.bf16.msra.mxu0 %v3728_v40  ;;  %3785 = vmatprep.subr.bf16.mxu1 %v3720_v54 }
 0x3b0   :  { %3733 = vmatprep.subr.bf16.mxu0 %v3732_v1 }
 0x3b2   :  { %3787 = vmatpush3.bf16.msra.mxu1 %v3720_v54 }
 0x3b3   :  { %3735 = vmatpush3.bf16.msra.mxu0 %v3732_v1  ;;  %3789 = vmatprep.subr.bf16.mxu1 %v3724_v0 }
 0x3b6   :  { %3791 = vmatpush3.bf16.msra.mxu1 %v3724_v0  ;;  %3440 = vmatmul.mubr.f32.vlgmr.msra.gmra.mrb[12].mxu0 %v3371_v34 }
 0x3b7   :  { %3793 = vmatprep.subr.bf16.mxu1 %v3728_v40 }
 0x3ba   :  { %3795 = vmatpush3.bf16.msra.mxu1 %v3728_v40 }
 0x3bb   :  { %3797 = vmatprep.subr.bf16.mxu1 %v3732_v1 }
 0x3be   :  { %3799 = vmatpush3.bf16.msra.mxu1 %v3732_v1 }
 0x3c1   :  { %3510 = vmatmul.mubr.f32.vlgmr.msra.gmra.mrb[8].mxu1 %v2324_v44 }
 0x469   :  { %v3406_v31 = vpop.f32.mrb[10].mxu0 }
 0x46a   :  { %v2573_v5 = vpop.f32.mrb[11].mxu0 }
 0x489   :  { %v3441_v43 = vpop.f32.mrb[12].mxu0 }
 0x48a   :  { %v4926_v4 = vsub.f32 %v3406_v31, %v3441_v43  ;;  %v2648_v6 = vpop.f32.mrb[13].mxu0 }
 0x48b   :  { %v4928_v42 = vsub.f32 %v2573_v5, %v2648_v6 }
 0x48c   :  { %v4931_v7 = vand.u32 2147483647, %v4926_v4  ;;  %v2810_v33 = vmul.f32 %v4926_v4, %v4926_v4  ;;  %vm2912_vm0 = vcmp.ne.f32.partialorder %v4926_v4, %v4926_v4 }
 0x48d   :  { %v4934_v29 = vand.u32 2147483647, %v4928_v42  ;;  %v2809_v8 = vmul.f32 %v4928_v42, %v4928_v42  ;;  %vm2865_vm13 = vcmp.ne.f32.partialorder %v4928_v42, %v4928_v42 }
 0x48e   :  { %vm2918_vm9 = vcmp.eq.s32.totalorder %v4931_v7, inf }
 0x48f   :  { %vm2871_vm3 = vcmp.eq.s32.totalorder %v4934_v29, inf }
 0x494   :  { %v4936_v37 = vpop.f32.mrb[8].mxu1 }
 0x495   :  { %v2812_v15 = vmul.f32 %v4936_v37, %v4936_v37  ;;  %v4943_v61 = vand.u32 2147483647, %v4936_v37  ;;  %vm2913_vm7 = vcmp.ne.f32.partialorder %v4936_v37, %v4936_v37  ;;  %v4949_v55 = vpop.f32.mrb[9].mxu1 }
 0x496   :  { %vm4951_vm8 = vmor %vm2912_vm0, %vm2913_vm7  ;;  %v2811_v18 = vmul.f32 %v4949_v55, %v4949_v55  ;;  %v4961_v22 = vand.u32 2147483647, %v4949_v55  ;;  %vm2866_vm15 = vcmp.ne.f32.partialorder %v4949_v55, %v4949_v55 }
 0x497   :  { %v2814_v28 = vadd.f32 %v2812_v15, %v2810_v33  ;;  %v2880_v24 = vmin.f32 %v4931_v7, %v4943_v61  ;;  %v2881_v35 = vmax.f32 %v4931_v7, %v4943_v61  ;;  %vm2902_vm10 = vcmp.gt.f32.partialorder %v4943_v61, %v4931_v7  ;;  %vm4985_vm2 = vmor %vm2865_vm13, %vm2866_vm15 }
 0x498   :  { %vm2919_vm11 = vcmp.eq.s32.totalorder %v4943_v61, inf  ;;  %v2813_v21 = vadd.f32 %v2811_v18, %v2809_v8  ;;  %v2833_v14 = vmin.f32 %v4934_v29, %v4961_v22  ;;  %v2834_v30 = vmax.f32 %v4934_v29, %v4961_v22 }
 0x499   :  { %3875 = vrsqrt.f32 %v2814_v28  ;;  %vm4974_vm12 = vmand %vm2918_vm9, %vm2919_vm11  ;;  %vm2855_vm14 = vcmp.gt.f32.partialorder %v4961_v22, %v4934_v29  ;;  %vm2872_vm1 = vcmp.eq.s32.totalorder %v4961_v22, inf  ;;  %vm2824_vm5 = vcmp.eq.f32.partialorder %v2814_v28, inf }
 0x49a   :  { %3877 = vrcp.f32 %v2881_v35  ;;  %vm4990_vm4 = vmand %vm2871_vm3, %vm2872_vm1  ;;  %v2827_v26 = vand.u32 2147483648, %v2814_v28  ;;  %vm2826_vm6 = vcmp.eq.f32.partialorder %v2814_v28, 0.0  ;;  %vm2817_vm0 = vcmp.eq.f32.partialorder %v2813_v21, inf }
 0x49b   :  { %3879 = vrsqrt.f32 %v2813_v21  ;;  %v2820_v57 = vand.u32 2147483648, %v2813_v21  ;;  %vm2819_vm7 = vcmp.eq.f32.partialorder %v2813_v21, 0.0  ;;  %vm2908_vm9 = vcmp.lt.s32.totalorder %v4926_v4, 0 }
 0x49c   :  { %3881 = vrcp.f32 %v2834_v30  ;;  %vm2905_vm11 = vcmp.lt.f32.partialorder %v4926_v4, 0.0  ;;  %vm2861_vm13 = vcmp.lt.s32.totalorder %v4928_v42, 0  ;;  %vm2910_vm15 = vcmp.eq.f32.partialorder %v4936_v37, 0.0 }
 0x4a3   :  { %v3876_v2 = vpop.eup %3875 }
 0x4a4   :  { %v3878_v16 = vpop.eup %3877  ;;  %v2823_v12 = vmul.f32 %v3876_v2, %v2814_v28 }
 0x4a5   :  { %v3880_v20 = vpop.eup %3879  ;;  %v2883_v59 = vmul.f32 %v3878_v16, %v2880_v24 }
 0x4a6   :  { %v3882_v53 = vpop.eup %3881  ;;  %v2825_v25 = vsel %vm2824_vm5, %v2814_v28, %v2823_v12  ;;  %v2816_v23 = vmul.f32 %v3880_v20, %v2813_v21 }
 0x4a7   :  { %v2828_v19 = vsel %vm2826_vm6, %v2827_v26, %v2825_v25  ;;  %v2884_v62 = vmul.f32 %v2883_v59, %v2883_v59  ;;  %v2836_v49 = vmul.f32 %v3882_v53, %v2833_v14  ;;  %v4006_v26 = vmov 0.0  }
 0x4a8   :  { %2830 = vst [vmem:[%s5042_s14 + $0x10] sm:$0xff] %v2828_v19  ;;  %v2818_v52 = vsel %vm2817_vm0, %v2813_v21, %v2816_v23  ;;  %v4007_v23 = vmov 0.7853982   ;;  %v2862_v19 = vsel %vm2861_vm13, 3.1415927, %v4006_v26 }
 0x4a9   :  { %v2885_v44 = vmul.f32 0.002785687, %v2884_v62  ;;  %v2821_v36 = vsel %vm2819_vm7, %v2820_v57, %v2818_v52  ;;  %v2837_v46 = vmul.f32 %v2836_v49, %v2836_v49  ;;  %v2917_v7 = vsel %vm2905_vm11, 2.3561945, %v4007_v23 }
 0x4aa   :  { %2829 = vst [vmem:[%s5042_s14] sm:$0xff] %v2821_v36  ;;  %v2923_v57 = vand.u32 2147483648, %v4936_v37  ;;  %v2876_v36 = vand.u32 2147483648, %v4949_v55 }
 0x4ab   :  { %v2886_v13 = vadd.f32 -0.015866, %v2885_v44  ;;  %v2838_v50 = vmul.f32 0.002785687, %v2837_v46 }
 0x4ad   :  { %v2887_v39 = vmul.f32 %v2886_v13, %v2884_v62  ;;  %v2839_v41 = vadd.f32 -0.015866, %v2838_v50 }
 0x4af   :  { %v2888_v51 = vadd.f32 0.04247222, %v2887_v39  ;;  %v2840_v32 = vmul.f32 %v2839_v41, %v2837_v46 }
 0x4b1   :  { %v2889_v48 = vmul.f32 %v2888_v51, %v2884_v62  ;;  %v2841_v34 = vadd.f32 0.04247222, %v2840_v32 }
 0x4b3   :  { %v2890_v60 = vadd.f32 -0.074975304, %v2889_v48  ;;  %v2842_v9 = vmul.f32 %v2841_v34, %v2837_v46 }
 0x4b5   :  { %v2891_v45 = vmul.f32 %v2890_v60, %v2884_v62  ;;  %v2843_v54 = vadd.f32 -0.074975304, %v2842_v9 }
 0x4b7   :  { %v2892_v58 = vadd.f32 0.1064488, %v2891_v45  ;;  %v2844_v63 = vmul.f32 %v2843_v54, %v2837_v46 }
 0x4b9   :  { %v2893_v0 = vmul.f32 %v2892_v58, %v2884_v62  ;;  %v2845_v3 = vadd.f32 0.1064488, %v2844_v63 }
 0x4bb   :  { %v2894_v47 = vadd.f32 -0.14207031, %v2893_v0  ;;  %v2846_v40 = vmul.f32 %v2845_v3, %v2837_v46 }
 0x4bd   :  { %v2895_v17 = vmul.f32 %v2894_v47, %v2884_v62  ;;  %v2847_v56 = vadd.f32 -0.14207031, %v2846_v40 }
 0x4bf   :  { %v2896_v1 = vadd.f32 0.19993454, %v2895_v17  ;;  %v2848_v31 = vmul.f32 %v2847_v56, %v2837_v46 }
 0x4c1   :  { %v2897_v5 = vmul.f32 %v2896_v1, %v2884_v62  ;;  %v2849_v43 = vadd.f32 0.19993454, %v2848_v31 }
 0x4c3   :  { %v2898_v6 = vadd.f32 -0.33333147, %v2897_v5  ;;  %v2850_v33 = vmul.f32 %v2849_v43, %v2837_v46 }
 0x4c5   :  { %v2899_v15 = vmul.f32 %v2898_v6, %v2884_v62  ;;  %v2851_v8 = vadd.f32 -0.33333147, %v2850_v33 }
 0x4c7   :  { %v2900_v18 = vmul.f32 %v2899_v15, %v2883_v59  ;;  %v2852_v28 = vmul.f32 %v2851_v8, %v2837_v46 }
 0x4c9   :  { %v2901_v24 = vadd.f32 %v2900_v18, %v2883_v59  ;;  %v2853_v35 = vmul.f32 %v2852_v28, %v2836_v49  ;;  %v2909_v59 = vsel %vm2908_vm9, 3.1415927, %v4006_v26 }
 0x4cb   :  { %v2903_v21 = vsub.f32 1.5707964, %v2901_v24  ;;  %v2854_v14 = vadd.f32 %v2853_v35, %v2836_v49 }
 0x4cd   :  { %v2904_v30 = vsel %vm2902_vm10, %v2903_v21, %v2901_v24  ;;  %v2856_v2 = vsub.f32 1.5707964, %v2854_v14  ;;  %vm2858_vm10 = vcmp.lt.f32.partialorder %v4928_v42, 0.0 }
 0x4ce   :  { %v2906_v16 = vsub.f32 3.1415927, %v2904_v30  ;;  %v2870_v52 = vsel %vm2858_vm10, 2.3561945, %v4007_v23 }
 0x4cf   :  { %v2857_v12 = vsel %vm2855_vm14, %v2856_v2, %v2854_v14  ;;  %vm2863_vm14 = vcmp.eq.f32.partialorder %v4949_v55, 0.0 }
 0x4d0   :  { %v2907_v20 = vsel %vm2905_vm11, %v2906_v16, %v2904_v30  ;;  %v2859_v53 = vsub.f32 3.1415927, %v2857_v12 }
 0x4d1   :  { %v2911_v25 = vsel %vm2910_vm15, %v2909_v59, %v2907_v20 }
 0x4d2   :  { %v2915_v4 = vsel %vm4951_vm8, nan, %v2911_v25  ;;  %v2860_v61 = vsel %vm2858_vm10, %v2859_v53, %v2857_v12 }
 0x4d3   :  { %v2921_v29 = vsel %vm4974_vm12, %v2917_v7, %v2915_v4  ;;  %v2864_v22 = vsel %vm2863_vm14, %v2862_v19, %v2860_v61 }
 0x4d4   :  { %v2922_v62 = vand.u32 2147483647, %v2921_v29  ;;  %v2868_v49 = vsel %vm4985_vm2, nan, %v2864_v22 }
 0x4d5   :  { %v2874_v42 = vsel %vm4990_vm4, %v2870_v52, %v2868_v49 }
 0x4d6   :  { %v2924_v38 = vor.u32 %v2923_v57, %v2922_v62  ;;  %v2875_v44 = vand.u32 2147483647, %v2874_v42 }
 0x4d8   :  { %2926 = vst [vmem:[%s5042_s14 + $0x18] sm:$0xff] %v2924_v38  ;;  %v2877_v10 = vor.u32 %v2876_v36, %v2875_v44 }
 0x4da   :  { %2925 = vst [vmem:[%s5042_s14 + $0x8] sm:$0xff] %v2877_v10 }
 0x4db   :  { %2931 = vsyncpa [#allocation3], 1 }
 0x4dc   :  { %2932 = vsyncpa [#allocation7], 1 }
 0x4dd   :  { %2933 = vsyncpa [#allocation10], 1 }
 0x4de   :  { %2934 = vsyncpa [#allocation4], 1 }

</bundles_post_ra>
